<compile_context>
chip_gen: v7x
topology: tpu7x:2x2x1
jax: 0.10.0
libtpu: 0.0.40
codegen_flags: <defaults>
</compile_context>

<pallas_src>
import math

import numpy as np

import jax
import jax.numpy as jnp
from jax.experimental import pallas as pl
from jax.experimental.pallas import tpu as pltpu


def _tap_mask(B, C, H, W):
    """(9*C, B*H*W) f32 mask: 1 where tap (kh, kw) reads inside the image."""
    HW = H * W
    mask = np.zeros((9 * C, B * HW), np.float32)
    hh, ww = np.meshgrid(np.arange(H), np.arange(W), indexing="ij")
    for kh in range(3):
        for kw in range(3):
            dy, dx = kh - 1, kw - 1
            valid = ((hh + dy >= 0) & (hh + dy < H) &
                     (ww + dx >= 0) & (ww + dx < W))
            row = np.tile(valid.reshape(HW).astype(np.float32), B)
            tap = kh * 3 + kw
            mask[tap * C:(tap + 1) * C, :] = row[None, :]
    return jnp.asarray(mask)


def _gap_matrix(B, H, W):
    """(B*H*W, B) f32 averaging matrix so that pooled = act2d @ gap."""
    HW = H * W
    g = np.zeros((B * HW, B), np.float32)
    for b in range(B):
        g[b * HW:(b + 1) * HW, b] = 1.0 / HW
    return jnp.asarray(g)


def gender_classifier_forward(x_nchw, conv_ws, conv_bs, fc_w, fc_b):
    """x_nchw: (B, C, H, W); conv_ws[l]: (C, C, 3, 3) OIHW; conv_bs[l]: (C,);
    fc_w: (num_classes, C) (PyTorch Linear layout); fc_b: (num_classes,).
    Returns logits of shape (B, num_classes)."""
    B, C, H, W = x_nchw.shape
    HW = H * W
    BHW = B * HW
    L = len(conv_ws)
    NC = fc_w.shape[0]

    # ---- lane-dense repack (pure layout plumbing, done once in the wrapper) --
    x2d = jnp.transpose(x_nchw, (1, 0, 2, 3)).reshape(C, BHW)          # (C, BHW)
    # Conv weights -> (L, C_out, 9*C_in); row index = (kh*3 + kw)*C + ci.
    w2d = jnp.stack([jnp.transpose(w, (0, 2, 3, 1)).reshape(C, 9 * C)
                     for w in conv_ws])                                # (L, C, 9C)
    b2d = jnp.stack([b.reshape(C, 1) for b in conv_bs])                # (L, C, 1)
    mask = _tap_mask(B, C, H, W)                                       # (9C, BHW)
    gap = _gap_matrix(B, H, W)                                         # (BHW, B)
    fcb2d = fc_b.reshape(NC, 1)                                        # (NC, 1)

    def kernel(x_ref, w_ref, b_ref, mask_ref, gap_ref, fcw_ref, fcb_ref,
               o_ref, act_ref, patch_ref):
        # act_ref:   (C, BHW)   VMEM scratch, current activation (lane-dense)
        # patch_ref: (9C, BHW)  VMEM scratch, im2col patch matrix
        act_ref[...] = x_ref[...]
        for l in range(L):
            # Assemble the 9 shifted taps: shift by `off` lanes is realized as
            # a sliced load + sliced store.  Destination lanes not written (or
            # written with wrapped/out-of-image data) are zeroed by `mask_ref`
            # below, which implements the conv's zero padding.
            for kh in range(3):
                for kw in range(3):
                    tap = kh * 3 + kw
                    off = (kh - 1) * W + (kw - 1)
                    r0 = tap * C
                    if off > 0:
                        patch_ref[r0:r0 + C, 0:BHW - off] = act_ref[:, off:BHW]
                    elif off < 0:
                        patch_ref[r0:r0 + C, -off:BHW] = act_ref[:, 0:BHW + off]
                    else:
                        patch_ref[r0:r0 + C, :] = act_ref[...]
            pmat = jnp.where(mask_ref[...] != 0.0, patch_ref[...], 0.0)
            y = jnp.dot(w_ref[l], pmat,
                        preferred_element_type=jnp.float32)          # (C, BHW)
            act_ref[...] = jnp.maximum(y + b_ref[l], 0.0)            # bias+ReLU
        # Global average pool (as a matmul) + FC head, still in VMEM.
        pooled = jnp.dot(act_ref[...], gap_ref[...],
                         preferred_element_type=jnp.float32)         # (C, B)
        o_ref[...] = (jnp.dot(fcw_ref[...], pooled,
                              preferred_element_type=jnp.float32)
                      + fcb_ref[...])                                # (NC, B)

    out_t = pl.pallas_call(
        kernel,
        out_shape=jax.ShapeDtypeStruct((NC, B), jnp.float32),
        grid=(1,),
        in_specs=[
            pl.BlockSpec((C, BHW), lambda i: (0, 0)),
            pl.BlockSpec((L, C, 9 * C), lambda i: (0, 0, 0)),
            pl.BlockSpec((L, C, 1), lambda i: (0, 0, 0)),
            pl.BlockSpec((9 * C, BHW), lambda i: (0, 0)),
            pl.BlockSpec((BHW, B), lambda i: (0, 0)),
            pl.BlockSpec((NC, C), lambda i: (0, 0)),
            pl.BlockSpec((NC, 1), lambda i: (0, 0)),
        ],
        out_specs=pl.BlockSpec((NC, B), lambda i: (0, 0)),
        scratch_shapes=[
            pltpu.VMEM((C, BHW), jnp.float32),        # activations
            pltpu.VMEM((9 * C, BHW), jnp.float32),    # im2col patches
        ],
        compiler_params=pltpu.CompilerParams(
            dimension_semantics=("arbitrary",)),
    )(x2d, w2d, b2d, mask, gap, fc_w, fcb2d)

    return out_t.T                                                   # (B, NC)


# Pure-JAX reference (silent correctness check).
def _reference_forward(x_nchw, conv_ws, conv_bs, fc_w, fc_b):
    x = x_nchw
    dn = jax.lax.conv_dimension_numbers(x.shape, conv_ws[0].shape,
                                        ("NCHW", "OIHW", "NCHW"))
    for w, b in zip(conv_ws, conv_bs):
        x = jax.lax.conv_general_dilated(x, w, (1, 1), "SAME",
                                         dimension_numbers=dn)
        x = jnp.maximum(x + b[None, :, None, None], 0.0)
    pooled = jnp.mean(x, axis=(2, 3))                                # (B, C)
    return pooled @ fc_w.T + fc_b[None, :]


if __name__ == "__main__":
    B, C, H, W = 2, 4, 16, 16
    num_classes, num_layers = 2, 3

    key = jax.random.PRNGKey(0)
    keys = jax.random.split(key, 2 * num_layers + 3)

    # Conv weights: normal(0, sqrt(2 / (kh*kw*out_channels))), like the module.
    conv_std = math.sqrt(2.0 / (3 * 3 * C))
    conv_ws, conv_bs = [], []
    for l in range(num_layers):
        conv_ws.append(conv_std * jax.random.normal(
            keys[2 * l], (C, C, 3, 3), dtype=jnp.float32))           # OIHW
        conv_bs.append(0.01 * jax.random.normal(
            keys[2 * l + 1], (C,), dtype=jnp.float32))

    # Linear head (PyTorch layout: (num_classes, C)).
    fc_bound = 1.0 / math.sqrt(C)
    fc_w = jax.random.uniform(keys[-3], (num_classes, C), dtype=jnp.float32,
                              minval=-fc_bound, maxval=fc_bound)
    fc_b = jax.random.uniform(keys[-2], (num_classes,), dtype=jnp.float32,
                              minval=-fc_bound, maxval=fc_bound)

    x = jax.random.normal(keys[-1], (B, C, H, W), dtype=jnp.float32)

    out = gender_classifier_forward(x, conv_ws, conv_bs, fc_w, fc_b)
    out = jax.block_until_ready(out)

    ref = _reference_forward(x, conv_ws, conv_bs, fc_w, fc_b)
    assert out.shape == (B, num_classes)
    assert jnp.allclose(out, ref, atol=1e-4, rtol=1e-4), \
        f"max err {jnp.max(jnp.abs(out - ref))}"

    print("KERNEL_OK")
</pallas_src>

<mosaic_0001>
module attributes {stable_mosaic.version = 11 : i64} {
  func.func @kernel(%arg0: i32, %arg1: memref<4x512xf32, #tpu.memory_space<vmem>>, %arg2: memref<3x4x36xf32, #tpu.memory_space<vmem>>, %arg3: memref<3x4x1xf32, #tpu.memory_space<vmem>>, %arg4: memref<36x512xf32, #tpu.memory_space<vmem>>, %arg5: memref<512x2xf32, #tpu.memory_space<vmem>>, %arg6: memref<2x4xf32, #tpu.memory_space<vmem>>, %arg7: memref<2x1xf32, #tpu.memory_space<vmem>>, %arg8: memref<2x2xf32, #tpu.memory_space<vmem>>, %arg9: memref<4x512xf32, #tpu.memory_space<vmem>>, %arg10: memref<36x512xf32, #tpu.memory_space<vmem>>) attributes {dimension_semantics = [#tpu.dimension_semantics<arbitrary>], iteration_bounds = array<i64: 1>, scalar_prefetch = 0 : i64, scratch_operands = 2 : i64, tpu.core_type = #tpu.core_type<tc>, window_params = [{pipeline_mode = #tpu.pipeline_mode<synchronous>, transform_indices = @transform_0, window_bounds = array<i64: 4, 512>}, {pipeline_mode = #tpu.pipeline_mode<synchronous>, transform_indices = @transform_1, window_bounds = array<i64: 3, 4, 36>}, {pipeline_mode = #tpu.pipeline_mode<synchronous>, transform_indices = @transform_2, window_bounds = array<i64: 3, 4, 1>}, {pipeline_mode = #tpu.pipeline_mode<synchronous>, transform_indices = @transform_3, window_bounds = array<i64: 36, 512>}, {pipeline_mode = #tpu.pipeline_mode<synchronous>, transform_indices = @transform_4, window_bounds = array<i64: 512, 2>}, {pipeline_mode = #tpu.pipeline_mode<synchronous>, transform_indices = @transform_5, window_bounds = array<i64: 2, 4>}, {pipeline_mode = #tpu.pipeline_mode<synchronous>, transform_indices = @transform_6, window_bounds = array<i64: 2, 1>}, {pipeline_mode = #tpu.pipeline_mode<synchronous>, transform_indices = @transform_7, window_bounds = array<i64: 2, 2>}]} {
    %c0 = arith.constant 0 : index
    %c0_0 = arith.constant 0 : index
    %0 = vector.load %arg1[%c0, %c0_0] : memref<4x512xf32, #tpu.memory_space<vmem>>, vector<4x512xf32>
    %c0_1 = arith.constant 0 : index
    %c0_2 = arith.constant 0 : index
    %1 = vector.load %arg9[%c0_1, %c0_2] : memref<4x512xf32, #tpu.memory_space<vmem>>, vector<4x512xf32>
    tpu.vector_store %arg9[%c0_1, %c0_2], %0 {strides = array<i32>} : memref<4x512xf32, #tpu.memory_space<vmem>>, vector<4x512xf32>,
    %c0_3 = arith.constant 0 : index
    %c0_4 = arith.constant 0 : index
    %2 = vector.load %arg9[%c0_3, %c0_4] : memref<4x512xf32, #tpu.memory_space<vmem>>, vector<4x495xf32>
    %c0_5 = arith.constant 0 : index
    %c17 = arith.constant 17 : index
    %3 = vector.load %arg10[%c0_5, %c17] : memref<36x512xf32, #tpu.memory_space<vmem>>, vector<4x495xf32>
    tpu.vector_store %arg10[%c0_5, %c17], %2 {strides = array<i32>} : memref<36x512xf32, #tpu.memory_space<vmem>>, vector<4x495xf32>,
    %c0_6 = arith.constant 0 : index
    %c0_7 = arith.constant 0 : index
    %4 = vector.load %arg9[%c0_6, %c0_7] : memref<4x512xf32, #tpu.memory_space<vmem>>, vector<4x496xf32>
    %c4 = arith.constant 4 : index
    %c16 = arith.constant 16 : index
    %5 = vector.load %arg10[%c4, %c16] : memref<36x512xf32, #tpu.memory_space<vmem>>, vector<4x496xf32>
    tpu.vector_store %arg10[%c4, %c16], %4 {strides = array<i32>} : memref<36x512xf32, #tpu.memory_space<vmem>>, vector<4x496xf32>,
    %c0_8 = arith.constant 0 : index
    %c0_9 = arith.constant 0 : index
    %6 = vector.load %arg9[%c0_8, %c0_9] : memref<4x512xf32, #tpu.memory_space<vmem>>, vector<4x497xf32>
    %c8 = arith.constant 8 : index
    %c15 = arith.constant 15 : index
    %7 = vector.load %arg10[%c8, %c15] : memref<36x512xf32, #tpu.memory_space<vmem>>, vector<4x497xf32>
    tpu.vector_store %arg10[%c8, %c15], %6 {strides = array<i32>} : memref<36x512xf32, #tpu.memory_space<vmem>>, vector<4x497xf32>,
    %c0_10 = arith.constant 0 : index
    %c0_11 = arith.constant 0 : index
    %8 = vector.load %arg9[%c0_10, %c0_11] : memref<4x512xf32, #tpu.memory_space<vmem>>, vector<4x511xf32>
    %c12 = arith.constant 12 : index
    %c1 = arith.constant 1 : index
    %9 = vector.load %arg10[%c12, %c1] : memref<36x512xf32, #tpu.memory_space<vmem>>, vector<4x511xf32>
    tpu.vector_store %arg10[%c12, %c1], %8 {strides = array<i32>} : memref<36x512xf32, #tpu.memory_space<vmem>>, vector<4x511xf32>,
    %c0_12 = arith.constant 0 : index
    %c0_13 = arith.constant 0 : index
    %10 = vector.load %arg9[%c0_12, %c0_13] : memref<4x512xf32, #tpu.memory_space<vmem>>, vector<4x512xf32>
    %c16_14 = arith.constant 16 : index
    %c0_15 = arith.constant 0 : index
    %11 = vector.load %arg10[%c16_14, %c0_15] : memref<36x512xf32, #tpu.memory_space<vmem>>, vector<4x512xf32>
    tpu.vector_store %arg10[%c16_14, %c0_15], %10 {strides = array<i32>} : memref<36x512xf32, #tpu.memory_space<vmem>>, vector<4x512xf32>,
    %c0_16 = arith.constant 0 : index
    %c1_17 = arith.constant 1 : index
    %12 = vector.load %arg9[%c0_16, %c1_17] : memref<4x512xf32, #tpu.memory_space<vmem>>, vector<4x511xf32>
    %c20 = arith.constant 20 : index
    %c0_18 = arith.constant 0 : index
    %13 = vector.load %arg10[%c20, %c0_18] : memref<36x512xf32, #tpu.memory_space<vmem>>, vector<4x511xf32>
    tpu.vector_store %arg10[%c20, %c0_18], %12 {strides = array<i32>} : memref<36x512xf32, #tpu.memory_space<vmem>>, vector<4x511xf32>,
    %c0_19 = arith.constant 0 : index
    %c15_20 = arith.constant 15 : index
    %14 = vector.load %arg9[%c0_19, %c15_20] : memref<4x512xf32, #tpu.memory_space<vmem>>, vector<4x497xf32>
    %c24 = arith.constant 24 : index
    %c0_21 = arith.constant 0 : index
    %15 = vector.load %arg10[%c24, %c0_21] : memref<36x512xf32, #tpu.memory_space<vmem>>, vector<4x497xf32>
    tpu.vector_store %arg10[%c24, %c0_21], %14 {strides = array<i32>} : memref<36x512xf32, #tpu.memory_space<vmem>>, vector<4x497xf32>,
    %c0_22 = arith.constant 0 : index
    %c16_23 = arith.constant 16 : index
    %16 = vector.load %arg9[%c0_22, %c16_23] : memref<4x512xf32, #tpu.memory_space<vmem>>, vector<4x496xf32>
    %c28 = arith.constant 28 : index
    %c0_24 = arith.constant 0 : index
    %17 = vector.load %arg10[%c28, %c0_24] : memref<36x512xf32, #tpu.memory_space<vmem>>, vector<4x496xf32>
    tpu.vector_store %arg10[%c28, %c0_24], %16 {strides = array<i32>} : memref<36x512xf32, #tpu.memory_space<vmem>>, vector<4x496xf32>,
    %c0_25 = arith.constant 0 : index
    %c17_26 = arith.constant 17 : index
    %18 = vector.load %arg9[%c0_25, %c17_26] : memref<4x512xf32, #tpu.memory_space<vmem>>, vector<4x495xf32>
    %c32 = arith.constant 32 : index
    %c0_27 = arith.constant 0 : index
    %19 = vector.load %arg10[%c32, %c0_27] : memref<36x512xf32, #tpu.memory_space<vmem>>, vector<4x495xf32>
    tpu.vector_store %arg10[%c32, %c0_27], %18 {strides = array<i32>} : memref<36x512xf32, #tpu.memory_space<vmem>>, vector<4x495xf32>,
    %c0_28 = arith.constant 0 : index
    %c0_29 = arith.constant 0 : index
    %20 = vector.load %arg4[%c0_28, %c0_29] : memref<36x512xf32, #tpu.memory_space<vmem>>, vector<36x512xf32>
    %cst = arith.constant 0.000000e+00 : f32
    %21 = vector.broadcast %cst : f32 to vector<36x512xf32>
    %22 = arith.cmpf one, %20, %21 : vector<36x512xf32>
    %c0_30 = arith.constant 0 : index
    %c0_31 = arith.constant 0 : index
    %23 = vector.load %arg10[%c0_30, %c0_31] : memref<36x512xf32, #tpu.memory_space<vmem>>, vector<36x512xf32>
    %cst_32 = arith.constant 0.000000e+00 : f32
    %24 = vector.broadcast %cst_32 : f32 to vector<36x512xf32>
    %25 = arith.select %22, %23, %24 : vector<36x512xi1>, vector<36x512xf32>
    %c0_33 = arith.constant 0 : index
    %c0_34 = arith.constant 0 : index
    %c0_35 = arith.constant 0 : index
    %26 = vector.load %arg2[%c0_33, %c0_34, %c0_35] : memref<3x4x36xf32, #tpu.memory_space<vmem>>, vector<1x4x36xf32>
    %27 = vector.shape_cast %26 : vector<1x4x36xf32> to vector<4x36xf32>
    %cst_36 = arith.constant dense<0.000000e+00> : vector<4x512xf32>
    %28 = tpu.matmul %27, %25, %cst_36 {dimension_numbers = #tpu.dot_dimension_numbers<[1], [0], [0], [1], [0, 0, 1, 1], [], []>} : vector<4x36xf32>, vector<36x512xf32>, vector<4x512xf32> -> vector<4x512xf32>
    %c0_37 = arith.constant 0 : index
    %c0_38 = arith.constant 0 : index
    %c0_39 = arith.constant 0 : index
    %29 = vector.load %arg3[%c0_37, %c0_38, %c0_39] : memref<3x4x1xf32, #tpu.memory_space<vmem>>, vector<1x4x1xf32>
    %30 = vector.shape_cast %29 : vector<1x4x1xf32> to vector<4x1xf32>
    %31 = vector.broadcast %30 : vector<4x1xf32> to vector<4x512xf32>
    %32 = arith.addf %28, %31 : vector<4x512xf32>
    %cst_40 = arith.constant 0.000000e+00 : f32
    %33 = vector.broadcast %cst_40 : f32 to vector<4x512xf32>
    %34 = arith.maximumf %32, %33 : vector<4x512xf32>
    %c0_41 = arith.constant 0 : index
    %c0_42 = arith.constant 0 : index
    %35 = vector.load %arg9[%c0_41, %c0_42] : memref<4x512xf32, #tpu.memory_space<vmem>>, vector<4x512xf32>
    tpu.vector_store %arg9[%c0_41, %c0_42], %34 {strides = array<i32>} : memref<4x512xf32, #tpu.memory_space<vmem>>, vector<4x512xf32>,
    %c0_43 = arith.constant 0 : index
    %c0_44 = arith.constant 0 : index
    %36 = vector.load %arg9[%c0_43, %c0_44] : memref<4x512xf32, #tpu.memory_space<vmem>>, vector<4x495xf32>
    %c0_45 = arith.constant 0 : index
    %c17_46 = arith.constant 17 : index
    %37 = vector.load %arg10[%c0_45, %c17_46] : memref<36x512xf32, #tpu.memory_space<vmem>>, vector<4x495xf32>
    tpu.vector_store %arg10[%c0_45, %c17_46], %36 {strides = array<i32>} : memref<36x512xf32, #tpu.memory_space<vmem>>, vector<4x495xf32>,
    %c0_47 = arith.constant 0 : index
    %c0_48 = arith.constant 0 : index
    %38 = vector.load %arg9[%c0_47, %c0_48] : memref<4x512xf32, #tpu.memory_space<vmem>>, vector<4x496xf32>
    %c4_49 = arith.constant 4 : index
    %c16_50 = arith.constant 16 : index
    %39 = vector.load %arg10[%c4_49, %c16_50] : memref<36x512xf32, #tpu.memory_space<vmem>>, vector<4x496xf32>
    tpu.vector_store %arg10[%c4_49, %c16_50], %38 {strides = array<i32>} : memref<36x512xf32, #tpu.memory_space<vmem>>, vector<4x496xf32>,
    %c0_51 = arith.constant 0 : index
    %c0_52 = arith.constant 0 : index
    %40 = vector.load %arg9[%c0_51, %c0_52] : memref<4x512xf32, #tpu.memory_space<vmem>>, vector<4x497xf32>
    %c8_53 = arith.constant 8 : index
    %c15_54 = arith.constant 15 : index
    %41 = vector.load %arg10[%c8_53, %c15_54] : memref<36x512xf32, #tpu.memory_space<vmem>>, vector<4x497xf32>
    tpu.vector_store %arg10[%c8_53, %c15_54], %40 {strides = array<i32>} : memref<36x512xf32, #tpu.memory_space<vmem>>, vector<4x497xf32>,
    %c0_55 = arith.constant 0 : index
    %c0_56 = arith.constant 0 : index
    %42 = vector.load %arg9[%c0_55, %c0_56] : memref<4x512xf32, #tpu.memory_space<vmem>>, vector<4x511xf32>
    %c12_57 = arith.constant 12 : index
    %c1_58 = arith.constant 1 : index
    %43 = vector.load %arg10[%c12_57, %c1_58] : memref<36x512xf32, #tpu.memory_space<vmem>>, vector<4x511xf32>
    tpu.vector_store %arg10[%c12_57, %c1_58], %42 {strides = array<i32>} : memref<36x512xf32, #tpu.memory_space<vmem>>, vector<4x511xf32>,
    %c0_59 = arith.constant 0 : index
    %c0_60 = arith.constant 0 : index
    %44 = vector.load %arg9[%c0_59, %c0_60] : memref<4x512xf32, #tpu.memory_space<vmem>>, vector<4x512xf32>
    %c16_61 = arith.constant 16 : index
    %c0_62 = arith.constant 0 : index
    %45 = vector.load %arg10[%c16_61, %c0_62] : memref<36x512xf32, #tpu.memory_space<vmem>>, vector<4x512xf32>
    tpu.vector_store %arg10[%c16_61, %c0_62], %44 {strides = array<i32>} : memref<36x512xf32, #tpu.memory_space<vmem>>, vector<4x512xf32>,
    %c0_63 = arith.constant 0 : index
    %c1_64 = arith.constant 1 : index
    %46 = vector.load %arg9[%c0_63, %c1_64] : memref<4x512xf32, #tpu.memory_space<vmem>>, vector<4x511xf32>
    %c20_65 = arith.constant 20 : index
    %c0_66 = arith.constant 0 : index
    %47 = vector.load %arg10[%c20_65, %c0_66] : memref<36x512xf32, #tpu.memory_space<vmem>>, vector<4x511xf32>
    tpu.vector_store %arg10[%c20_65, %c0_66], %46 {strides = array<i32>} : memref<36x512xf32, #tpu.memory_space<vmem>>, vector<4x511xf32>,
    %c0_67 = arith.constant 0 : index
    %c15_68 = arith.constant 15 : index
    %48 = vector.load %arg9[%c0_67, %c15_68] : memref<4x512xf32, #tpu.memory_space<vmem>>, vector<4x497xf32>
    %c24_69 = arith.constant 24 : index
    %c0_70 = arith.constant 0 : index
    %49 = vector.load %arg10[%c24_69, %c0_70] : memref<36x512xf32, #tpu.memory_space<vmem>>, vector<4x497xf32>
    tpu.vector_store %arg10[%c24_69, %c0_70], %48 {strides = array<i32>} : memref<36x512xf32, #tpu.memory_space<vmem>>, vector<4x497xf32>,
    %c0_71 = arith.constant 0 : index
    %c16_72 = arith.constant 16 : index
    %50 = vector.load %arg9[%c0_71, %c16_72] : memref<4x512xf32, #tpu.memory_space<vmem>>, vector<4x496xf32>
    %c28_73 = arith.constant 28 : index
    %c0_74 = arith.constant 0 : index
    %51 = vector.load %arg10[%c28_73, %c0_74] : memref<36x512xf32, #tpu.memory_space<vmem>>, vector<4x496xf32>
    tpu.vector_store %arg10[%c28_73, %c0_74], %50 {strides = array<i32>} : memref<36x512xf32, #tpu.memory_space<vmem>>, vector<4x496xf32>,
    %c0_75 = arith.constant 0 : index
    %c17_76 = arith.constant 17 : index
    %52 = vector.load %arg9[%c0_75, %c17_76] : memref<4x512xf32, #tpu.memory_space<vmem>>, vector<4x495xf32>
    %c32_77 = arith.constant 32 : index
    %c0_78 = arith.constant 0 : index
    %53 = vector.load %arg10[%c32_77, %c0_78] : memref<36x512xf32, #tpu.memory_space<vmem>>, vector<4x495xf32>
    tpu.vector_store %arg10[%c32_77, %c0_78], %52 {strides = array<i32>} : memref<36x512xf32, #tpu.memory_space<vmem>>, vector<4x495xf32>,
    %c0_79 = arith.constant 0 : index
    %c0_80 = arith.constant 0 : index
    %54 = vector.load %arg4[%c0_79, %c0_80] : memref<36x512xf32, #tpu.memory_space<vmem>>, vector<36x512xf32>
    %cst_81 = arith.constant 0.000000e+00 : f32
    %55 = vector.broadcast %cst_81 : f32 to vector<36x512xf32>
    %56 = arith.cmpf one, %54, %55 : vector<36x512xf32>
    %c0_82 = arith.constant 0 : index
    %c0_83 = arith.constant 0 : index
    %57 = vector.load %arg10[%c0_82, %c0_83] : memref<36x512xf32, #tpu.memory_space<vmem>>, vector<36x512xf32>
    %cst_84 = arith.constant 0.000000e+00 : f32
    %58 = vector.broadcast %cst_84 : f32 to vector<36x512xf32>
    %59 = arith.select %56, %57, %58 : vector<36x512xi1>, vector<36x512xf32>
    %c1_85 = arith.constant 1 : index
    %c0_86 = arith.constant 0 : index
    %c0_87 = arith.constant 0 : index
    %60 = vector.load %arg2[%c1_85, %c0_86, %c0_87] : memref<3x4x36xf32, #tpu.memory_space<vmem>>, vector<1x4x36xf32>
    %61 = vector.shape_cast %60 : vector<1x4x36xf32> to vector<4x36xf32>
    %cst_88 = arith.constant dense<0.000000e+00> : vector<4x512xf32>
    %62 = tpu.matmul %61, %59, %cst_88 {dimension_numbers = #tpu.dot_dimension_numbers<[1], [0], [0], [1], [0, 0, 1, 1], [], []>} : vector<4x36xf32>, vector<36x512xf32>, vector<4x512xf32> -> vector<4x512xf32>
    %c1_89 = arith.constant 1 : index
    %c0_90 = arith.constant 0 : index
    %c0_91 = arith.constant 0 : index
    %63 = vector.load %arg3[%c1_89, %c0_90, %c0_91] : memref<3x4x1xf32, #tpu.memory_space<vmem>>, vector<1x4x1xf32>
    %64 = vector.shape_cast %63 : vector<1x4x1xf32> to vector<4x1xf32>
    %65 = vector.broadcast %64 : vector<4x1xf32> to vector<4x512xf32>
    %66 = arith.addf %62, %65 : vector<4x512xf32>
    %cst_92 = arith.constant 0.000000e+00 : f32
    %67 = vector.broadcast %cst_92 : f32 to vector<4x512xf32>
    %68 = arith.maximumf %66, %67 : vector<4x512xf32>
    %c0_93 = arith.constant 0 : index
    %c0_94 = arith.constant 0 : index
    %69 = vector.load %arg9[%c0_93, %c0_94] : memref<4x512xf32, #tpu.memory_space<vmem>>, vector<4x512xf32>
    tpu.vector_store %arg9[%c0_93, %c0_94], %68 {strides = array<i32>} : memref<4x512xf32, #tpu.memory_space<vmem>>, vector<4x512xf32>,
    %c0_95 = arith.constant 0 : index
    %c0_96 = arith.constant 0 : index
    %70 = vector.load %arg9[%c0_95, %c0_96] : memref<4x512xf32, #tpu.memory_space<vmem>>, vector<4x495xf32>
    %c0_97 = arith.constant 0 : index
    %c17_98 = arith.constant 17 : index
    %71 = vector.load %arg10[%c0_97, %c17_98] : memref<36x512xf32, #tpu.memory_space<vmem>>, vector<4x495xf32>
    tpu.vector_store %arg10[%c0_97, %c17_98], %70 {strides = array<i32>} : memref<36x512xf32, #tpu.memory_space<vmem>>, vector<4x495xf32>,
    %c0_99 = arith.constant 0 : index
    %c0_100 = arith.constant 0 : index
    %72 = vector.load %arg9[%c0_99, %c0_100] : memref<4x512xf32, #tpu.memory_space<vmem>>, vector<4x496xf32>
    %c4_101 = arith.constant 4 : index
    %c16_102 = arith.constant 16 : index
    %73 = vector.load %arg10[%c4_101, %c16_102] : memref<36x512xf32, #tpu.memory_space<vmem>>, vector<4x496xf32>
    tpu.vector_store %arg10[%c4_101, %c16_102], %72 {strides = array<i32>} : memref<36x512xf32, #tpu.memory_space<vmem>>, vector<4x496xf32>,
    %c0_103 = arith.constant 0 : index
    %c0_104 = arith.constant 0 : index
    %74 = vector.load %arg9[%c0_103, %c0_104] : memref<4x512xf32, #tpu.memory_space<vmem>>, vector<4x497xf32>
    %c8_105 = arith.constant 8 : index
    %c15_106 = arith.constant 15 : index
    %75 = vector.load %arg10[%c8_105, %c15_106] : memref<36x512xf32, #tpu.memory_space<vmem>>, vector<4x497xf32>
    tpu.vector_store %arg10[%c8_105, %c15_106], %74 {strides = array<i32>} : memref<36x512xf32, #tpu.memory_space<vmem>>, vector<4x497xf32>,
    %c0_107 = arith.constant 0 : index
    %c0_108 = arith.constant 0 : index
    %76 = vector.load %arg9[%c0_107, %c0_108] : memref<4x512xf32, #tpu.memory_space<vmem>>, vector<4x511xf32>
    %c12_109 = arith.constant 12 : index
    %c1_110 = arith.constant 1 : index
    %77 = vector.load %arg10[%c12_109, %c1_110] : memref<36x512xf32, #tpu.memory_space<vmem>>, vector<4x511xf32>
    tpu.vector_store %arg10[%c12_109, %c1_110], %76 {strides = array<i32>} : memref<36x512xf32, #tpu.memory_space<vmem>>, vector<4x511xf32>,
    %c0_111 = arith.constant 0 : index
    %c0_112 = arith.constant 0 : index
    %78 = vector.load %arg9[%c0_111, %c0_112] : memref<4x512xf32, #tpu.memory_space<vmem>>, vector<4x512xf32>
    %c16_113 = arith.constant 16 : index
    %c0_114 = arith.constant 0 : index
    %79 = vector.load %arg10[%c16_113, %c0_114] : memref<36x512xf32, #tpu.memory_space<vmem>>, vector<4x512xf32>
    tpu.vector_store %arg10[%c16_113, %c0_114], %78 {strides = array<i32>} : memref<36x512xf32, #tpu.memory_space<vmem>>, vector<4x512xf32>,
    %c0_115 = arith.constant 0 : index
    %c1_116 = arith.constant 1 : index
    %80 = vector.load %arg9[%c0_115, %c1_116] : memref<4x512xf32, #tpu.memory_space<vmem>>, vector<4x511xf32>
    %c20_117 = arith.constant 20 : index
    %c0_118 = arith.constant 0 : index
    %81 = vector.load %arg10[%c20_117, %c0_118] : memref<36x512xf32, #tpu.memory_space<vmem>>, vector<4x511xf32>
    tpu.vector_store %arg10[%c20_117, %c0_118], %80 {strides = array<i32>} : memref<36x512xf32, #tpu.memory_space<vmem>>, vector<4x511xf32>,
    %c0_119 = arith.constant 0 : index
    %c15_120 = arith.constant 15 : index
    %82 = vector.load %arg9[%c0_119, %c15_120] : memref<4x512xf32, #tpu.memory_space<vmem>>, vector<4x497xf32>
    %c24_121 = arith.constant 24 : index
    %c0_122 = arith.constant 0 : index
    %83 = vector.load %arg10[%c24_121, %c0_122] : memref<36x512xf32, #tpu.memory_space<vmem>>, vector<4x497xf32>
    tpu.vector_store %arg10[%c24_121, %c0_122], %82 {strides = array<i32>} : memref<36x512xf32, #tpu.memory_space<vmem>>, vector<4x497xf32>,
    %c0_123 = arith.constant 0 : index
    %c16_124 = arith.constant 16 : index
    %84 = vector.load %arg9[%c0_123, %c16_124] : memref<4x512xf32, #tpu.memory_space<vmem>>, vector<4x496xf32>
    %c28_125 = arith.constant 28 : index
    %c0_126 = arith.constant 0 : index
    %85 = vector.load %arg10[%c28_125, %c0_126] : memref<36x512xf32, #tpu.memory_space<vmem>>, vector<4x496xf32>
    tpu.vector_store %arg10[%c28_125, %c0_126], %84 {strides = array<i32>} : memref<36x512xf32, #tpu.memory_space<vmem>>, vector<4x496xf32>,
    %c0_127 = arith.constant 0 : index
    %c17_128 = arith.constant 17 : index
    %86 = vector.load %arg9[%c0_127, %c17_128] : memref<4x512xf32, #tpu.memory_space<vmem>>, vector<4x495xf32>
    %c32_129 = arith.constant 32 : index
    %c0_130 = arith.constant 0 : index
    %87 = vector.load %arg10[%c32_129, %c0_130] : memref<36x512xf32, #tpu.memory_space<vmem>>, vector<4x495xf32>
    tpu.vector_store %arg10[%c32_129, %c0_130], %86 {strides = array<i32>} : memref<36x512xf32, #tpu.memory_space<vmem>>, vector<4x495xf32>,
    %c0_131 = arith.constant 0 : index
    %c0_132 = arith.constant 0 : index
    %88 = vector.load %arg4[%c0_131, %c0_132] : memref<36x512xf32, #tpu.memory_space<vmem>>, vector<36x512xf32>
    %cst_133 = arith.constant 0.000000e+00 : f32
    %89 = vector.broadcast %cst_133 : f32 to vector<36x512xf32>
    %90 = arith.cmpf one, %88, %89 : vector<36x512xf32>
    %c0_134 = arith.constant 0 : index
    %c0_135 = arith.constant 0 : index
    %91 = vector.load %arg10[%c0_134, %c0_135] : memref<36x512xf32, #tpu.memory_space<vmem>>, vector<36x512xf32>
    %cst_136 = arith.constant 0.000000e+00 : f32
    %92 = vector.broadcast %cst_136 : f32 to vector<36x512xf32>
    %93 = arith.select %90, %91, %92 : vector<36x512xi1>, vector<36x512xf32>
    %c2 = arith.constant 2 : index
    %c0_137 = arith.constant 0 : index
    %c0_138 = arith.constant 0 : index
    %94 = vector.load %arg2[%c2, %c0_137, %c0_138] : memref<3x4x36xf32, #tpu.memory_space<vmem>>, vector<1x4x36xf32>
    %95 = vector.shape_cast %94 : vector<1x4x36xf32> to vector<4x36xf32>
    %cst_139 = arith.constant dense<0.000000e+00> : vector<4x512xf32>
    %96 = tpu.matmul %95, %93, %cst_139 {dimension_numbers = #tpu.dot_dimension_numbers<[1], [0], [0], [1], [0, 0, 1, 1], [], []>} : vector<4x36xf32>, vector<36x512xf32>, vector<4x512xf32> -> vector<4x512xf32>
    %c2_140 = arith.constant 2 : index
    %c0_141 = arith.constant 0 : index
    %c0_142 = arith.constant 0 : index
    %97 = vector.load %arg3[%c2_140, %c0_141, %c0_142] : memref<3x4x1xf32, #tpu.memory_space<vmem>>, vector<1x4x1xf32>
    %98 = vector.shape_cast %97 : vector<1x4x1xf32> to vector<4x1xf32>
    %99 = vector.broadcast %98 : vector<4x1xf32> to vector<4x512xf32>
    %100 = arith.addf %96, %99 : vector<4x512xf32>
    %cst_143 = arith.constant 0.000000e+00 : f32
    %101 = vector.broadcast %cst_143 : f32 to vector<4x512xf32>
    %102 = arith.maximumf %100, %101 : vector<4x512xf32>
    %c0_144 = arith.constant 0 : index
    %c0_145 = arith.constant 0 : index
    %103 = vector.load %arg9[%c0_144, %c0_145] : memref<4x512xf32, #tpu.memory_space<vmem>>, vector<4x512xf32>
    tpu.vector_store %arg9[%c0_144, %c0_145], %102 {strides = array<i32>} : memref<4x512xf32, #tpu.memory_space<vmem>>, vector<4x512xf32>,
    %c0_146 = arith.constant 0 : index
    %c0_147 = arith.constant 0 : index
    %104 = vector.load %arg9[%c0_146, %c0_147] : memref<4x512xf32, #tpu.memory_space<vmem>>, vector<4x512xf32>
    %c0_148 = arith.constant 0 : index
    %c0_149 = arith.constant 0 : index
    %105 = vector.load %arg5[%c0_148, %c0_149] : memref<512x2xf32, #tpu.memory_space<vmem>>, vector<512x2xf32>
    %cst_150 = arith.constant dense<0.000000e+00> : vector<4x2xf32>
    %106 = tpu.matmul %104, %105, %cst_150 {dimension_numbers = #tpu.dot_dimension_numbers<[1], [0], [0], [1], [0, 0, 1, 1], [], []>} : vector<4x512xf32>, vector<512x2xf32>, vector<4x2xf32> -> vector<4x2xf32>
    %c0_151 = arith.constant 0 : index
    %c0_152 = arith.constant 0 : index
    %107 = vector.load %arg6[%c0_151, %c0_152] : memref<2x4xf32, #tpu.memory_space<vmem>>, vector<2x4xf32>
    %cst_153 = arith.constant dense<0.000000e+00> : vector<2x2xf32>
    %108 = tpu.matmul %107, %106, %cst_153 {dimension_numbers = #tpu.dot_dimension_numbers<[1], [0], [0], [1], [0, 0, 1, 1], [], []>} : vector<2x4xf32>, vector<4x2xf32>, vector<2x2xf32> -> vector<2x2xf32>
    %c0_154 = arith.constant 0 : index
    %c0_155 = arith.constant 0 : index
    %109 = vector.load %arg7[%c0_154, %c0_155] : memref<2x1xf32, #tpu.memory_space<vmem>>, vector<2x1xf32>
    %110 = vector.broadcast %109 : vector<2x1xf32> to vector<2x2xf32>
    %111 = arith.addf %108, %110 : vector<2x2xf32>
    %c0_156 = arith.constant 0 : index
    %c0_157 = arith.constant 0 : index
    %112 = vector.load %arg8[%c0_156, %c0_157] : memref<2x2xf32, #tpu.memory_space<vmem>>, vector<2x2xf32>
    tpu.vector_store %arg8[%c0_156, %c0_157], %111 {strides = array<i32>} : memref<2x2xf32, #tpu.memory_space<vmem>>, vector<2x2xf32>,
    return
  }
  func.func @transform_0(%arg0: i32) -> (i32, i32) {
    %c0_i32 = arith.constant 0 : i32
    %c0_i32_0 = arith.constant 0 : i32
    %c0_i32_1 = arith.constant 0 : i32
    return %c0_i32, %c0_i32_0 : i32, i32
  }
  func.func @transform_1(%arg0: i32) -> (i32, i32, i32) {
    %c0_i32 = arith.constant 0 : i32
    %c0_i32_0 = arith.constant 0 : i32
    %c0_i32_1 = arith.constant 0 : i32
    %c0_i32_2 = arith.constant 0 : i32
    return %c0_i32, %c0_i32_0, %c0_i32_1 : i32, i32, i32
  }
  func.func @transform_2(%arg0: i32) -> (i32, i32, i32) {
    %c0_i32 = arith.constant 0 : i32
    %c0_i32_0 = arith.constant 0 : i32
    %c0_i32_1 = arith.constant 0 : i32
    %c0_i32_2 = arith.constant 0 : i32
    return %c0_i32, %c0_i32_0, %c0_i32_1 : i32, i32, i32
  }
  func.func @transform_3(%arg0: i32) -> (i32, i32) {
    %c0_i32 = arith.constant 0 : i32
    %c0_i32_0 = arith.constant 0 : i32
    %c0_i32_1 = arith.constant 0 : i32
    return %c0_i32, %c0_i32_0 : i32, i32
  }
  func.func @transform_4(%arg0: i32) -> (i32, i32) {
    %c0_i32 = arith.constant 0 : i32
    %c0_i32_0 = arith.constant 0 : i32
    %c0_i32_1 = arith.constant 0 : i32
    return %c0_i32, %c0_i32_0 : i32, i32
  }
  func.func @transform_5(%arg0: i32) -> (i32, i32) {
    %c0_i32 = arith.constant 0 : i32
    %c0_i32_0 = arith.constant 0 : i32
    %c0_i32_1 = arith.constant 0 : i32
    return %c0_i32, %c0_i32_0 : i32, i32
  }
  func.func @transform_6(%arg0: i32) -> (i32, i32) {
    %c0_i32 = arith.constant 0 : i32
    %c0_i32_0 = arith.constant 0 : i32
    %c0_i32_1 = arith.constant 0 : i32
    return %c0_i32, %c0_i32_0 : i32, i32
  }
  func.func @transform_7(%arg0: i32) -> (i32, i32) {
    %c0_i32 = arith.constant 0 : i32
    %c0_i32_0 = arith.constant 0 : i32
    %c0_i32_1 = arith.constant 0 : i32
    return %c0_i32, %c0_i32_0 : i32, i32
  }
}

</mosaic_0001>

<bundles_post_ra>
// kernel: tpu_custom_call.1
= control target key start
LH: loop header
LB: loop body
LE: loop exit
PB: predicated region body
PF: predicated region fallthrough
CT: control target
= control target key end

     0   :  { %s2112_s28 = smov 17   ;;  %s2811_s0 = inlined_call_operand.vmem [shape: f32[4,512], index: 0, kind: input, shape index: {}]   ;;  %s2812_s1 = inlined_call_operand.vmem [shape: f32[3,4,36], index: 1, kind: input, shape index: {}]   ;;  %s2813_s2 = inlined_call_operand.vmem [shape: f32[3,4,1], index: 2, kind: input, shape index: {}]   ;;  %s2814_s3 = inlined_call_operand.vmem [shape: f32[36,512], index: 3, kind: input, shape index: {}]   ;;  %s2815_s4 = inlined_call_operand.vmem [shape: f32[512,2], index: 4, kind: input, shape index: {}]   ;;  %s2816_s5 = inlined_call_operand.vmem [shape: f32[2,4], index: 5, kind: input, shape index: {}]   ;;  %s2817_s6 = inlined_call_operand.vmem [shape: f32[2,1], index: 6, kind: input, shape index: {}]   ;;  %s2818_s7 = inlined_call_operand.hbm [shape: f32[2,2], index: 7, kind: output, shape index: {}]  }
   0x1   :  { %v28_v0 = vld [vmem:[%s2811_s0 + $0x8] sm:$0xff]  ;;  %v27_v1 = vld [vmem:[%s2811_s0] sm:$0xff] }
   0x2   :  { %41 = vrot.lane.b32.xlu1 %v28_v0, %s2112_s28  ;;  %149 = vst [vmem:[#allocation3 + $0x50] sm:$0xf] %v28_v0  ;;  %37 = vrot.lane.b32.xlu0 %v27_v1, %s2112_s28  ;;  %147 = vst [vmem:[#allocation3 + $0x40] sm:$0xf] %v27_v1  ;;  %v36_v2 = vcombine.high %v28_v0, %v28_v0  ;;  %v35_v3 = vcombine.high %v27_v1, %v27_v1 }
   0x3   :  { %12 = vsyncpa [#allocation5], 0  ;;  %v62_v4 = vcombine.low %v27_v1, %v27_v1  ;;  %s2113_s29 = smov 16   ;;  %v63_v5 = vcombine.low %v28_v0, %v28_v0  ;;  %s2114_s0 = smov 15   ;;  %v2120_v6 = vmov 0.0   ;;  %v2121_v7 = vmov 0  }
   0x4   :  { %150 = vst [vmem:[#allocation3 + $0x58] sm:$0xf] %v36_v2  ;;  %148 = vst [vmem:[#allocation3 + $0x48] sm:$0xf] %v35_v3  ;;  %s2115_s30 = smov 1   ;;  %s2116_s8 = smov 127   ;;  %427 = vmatprep.mubr.f32.mxu0 %v2120_v6  ;;  %498 = vmatprep.mubr.f32.mxu1 %v2120_v6 }
   0x5   :  { %s2117_s9 = smov 113   ;;  %s2118_s10 = smov 112   ;;  %2082 = vset.pattern.permute.xlu0 %v2121_v7  ;;  %2083 = vset.pattern.permute.xlu1 %v2121_v7  ;;  %v340_v8 = vld [vmem:[%s2813_s2] sm:$0xf]  ;;  %vm2830_vm0 = vcmask 1043592   ;;  %vm2828_vm1 = vcmask 138240  }
   0x6   :  { %43 = vrot.lane.b32.xlu1 %v36_v2, %s2112_s28  ;;  %39 = vrot.lane.b32.xlu0 %v35_v3, %s2112_s28  ;;  %s2119_s11 = smov 111   ;;  %vm2822_vm2 = vcmask 130048   ;;  %vm2832_vm3 = vcmask 1047684   ;;  %vm2820_vm4 = vcmask 121856   ;;  %vm2821_vm5 = vcmask 1043576   ;;  %v260_v33 = vld [vmem:[%s2814_s3 + $0x8] sm:$0xff] }
   0x7   :  { %vm2819_vm6 = vcmask 7168   ;;  %vm2831_vm7 = vcmask 1047564   ;;  %v264_v34 = vld [vmem:[%s2814_s3 + $0x28] sm:$0xff]  ;;  %v259_v37 = vld [vmem:[%s2814_s3] sm:$0xff]  ;;  %vm2826_vm8 = vcmask 1039360   ;;  %vm280_vm9 = vcmp.ne.f32.partialorder %v260_v33, 0.0 }
   0x8   :  { %v263_v38 = vld [vmem:[%s2814_s3 + $0x20] sm:$0xff]  ;;  %vm284_vm10 = vcmp.ne.f32.partialorder %v264_v34, 0.0  ;;  %v262_v41 = vld [vmem:[%s2814_s3 + $0x18] sm:$0xff]  ;;  %vm279_vm11 = vcmp.ne.f32.partialorder %v259_v37, 0.0  ;;  %v261_v46 = vld [vmem:[%s2814_s3 + $0x10] sm:$0xff] }
   0x9   :  { %v266_v42 = vld [vmem:[%s2814_s3 + $0x38] sm:$0xff]  ;;  %vm283_vm12 = vcmp.ne.f32.partialorder %v263_v38, 0.0  ;;  %v265_v47 = vld [vmem:[%s2814_s3 + $0x30] sm:$0xff]  ;;  %vm2248_vm13 = vmpackc.low %vm284_vm10, %vm280_vm9  ;;  %vm282_vm14 = vcmp.ne.f32.partialorder %v262_v41, 0.0  ;;  %vm2829_vm10 = vcmask 916480  }
   0xa   :  { %66 = vrot.lane.b32.xlu1 %v27_v1, %s2113_s29  ;;  %64 = vrot.lane.b32.xlu0 %v62_v4, %s2113_s29  ;;  %vm286_vm15 = vcmp.ne.f32.partialorder %v266_v42, 0.0  ;;  %v268_v7 = vld [vmem:[%s2814_s3 + $0x48] sm:$0xff] }
   0xb   :  { %vm2260_vm9 = vmpackc.low %vm286_vm15, %vm282_vm14  ;;  %v276_v37 = vld [vmem:[%s2814_s3 + $0x88] sm:$0xf] }
   0xc   :  { %v1821_v34 = vld [vmem:[%s2812_s1 + $0x8] sm:$0xf] }
   0xe   :  { %70 = vrot.lane.b32.xlu1 %v28_v0, %s2113_s29  ;;  %68 = vrot.lane.b32.xlu0 %v63_v5, %s2113_s29 }
  0x12   :  { %93 = vrot.lane.b32.xlu1 %v35_v3, %s2114_s0  ;;  %91 = vrot.lane.b32.xlu0 %v27_v1, %s2114_s0 }
  0x16   :  { %97 = vrot.lane.b32.xlu1 %v36_v2, %s2114_s0  ;;  %95 = vrot.lane.b32.xlu0 %v28_v0, %s2114_s0 }
  0x1a   :  { %120 = vrot.lane.b32.xlu1 %v27_v1, %s2115_s30  ;;  %118 = vrot.lane.b32.xlu0 %v62_v4, %s2115_s30 }
  0x1e   :  { %124 = vrot.lane.b32.xlu1 %v28_v0, %s2115_s30  ;;  %122 = vrot.lane.b32.xlu0 %v63_v5, %s2115_s30 }
  0x22   :  { %161 = vrot.lane.b32.xlu1 %v63_v5, %s2116_s8  ;;  %159 = vrot.lane.b32.xlu0 %v27_v1, %s2116_s8 }
  0x26   :  { %188 = vrot.lane.b32.xlu1 %v28_v0, %s2117_s9  ;;  %186 = vrot.lane.b32.xlu0 %v35_v3, %s2117_s9 }
  0x2a   :  { %215 = vrot.lane.b32.xlu1 %v63_v5, %s2118_s10  ;;  %213 = vrot.lane.b32.xlu0 %v27_v1, %s2118_s10 }
  0x2e   :  { %163 = vrot.lane.b32.xlu1 %v28_v0, %s2116_s8  ;;  %157 = vrot.lane.b32.xlu0 %v62_v4, %s2116_s8 }
  0x32   :  { %190 = vrot.lane.b32.xlu1 %v36_v2, %s2117_s9  ;;  %184 = vrot.lane.b32.xlu0 %v27_v1, %s2117_s9 }
  0x36   :  { %217 = vrot.lane.b32.xlu1 %v28_v0, %s2118_s10  ;;  %211 = vrot.lane.b32.xlu0 %v62_v4, %s2118_s10 }
  0x3a   :  { %242 = vrot.lane.b32.xlu1 %v28_v0, %s2119_s11  ;;  %240 = vrot.lane.b32.xlu0 %v35_v3, %s2119_s11 }
  0x3e   :  { %244 = vrot.lane.b32.xlu1 %v36_v2, %s2119_s11  ;;  %238 = vrot.lane.b32.xlu0 %v27_v1, %s2119_s11 }
  0x42   :  { %343 = vperm.xlu0 %2082, %v340_v8   ;;  %v272_v8 = vld [vmem:[%s2814_s3 + $0x68] sm:$0xff] }
  0x43   :  { %vm292_vm14 = vcmp.ne.f32.partialorder %v272_v8, 0.0 }
  0x74   :  { %v42_v9 = vpop.permute.xlu1 %41  ;;  %v38_v10 = vpop.permute.xlu0 %37 }
  0x75   :  { %54 = vst.msk [vmem:[#allocation3] sm:$0xf] %vm2830_vm0, %v38_v10  ;;  %vm2835_vm0 = vcmask 904192  }
  0x78   :  { %v44_v11 = vpop.permute.xlu1 %43  ;;  %v40_v12 = vpop.permute.xlu0 %39 }
  0x79   :  { %v48_v13 = vsel %vm2828_vm1, %v42_v9, %v44_v11  ;;  %v46_v14 = vsel %vm2828_vm1, %v38_v10, %v40_v12  ;;  %v47_v15 = vsel %vm2828_vm1, %v40_v12, %v42_v9 }
  0x7a   :  { %57 = vst [vmem:[#allocation3 + $0x18] sm:$0xf] %v48_v13  ;;  %55 = vst [vmem:[#allocation3 + $0x8] sm:$0xf] %v46_v14 }
  0x7b   :  { %56 = vst [vmem:[#allocation3 + $0x10] sm:$0xf] %v47_v15 }
  0x7c   :  { %v67_v16 = vpop.permute.xlu1 %66  ;;  %v65_v17 = vpop.permute.xlu0 %64 }
  0x7d   :  { %v73_v18 = vsel %vm2822_vm2, %v65_v17, %v67_v16  ;;  %81 = vst.msk [vmem:[#allocation3] sm:$0xf0] %vm2832_vm3, %v65_v17 }
  0x7e   :  { %82 = vst [vmem:[#allocation3 + $0x8] sm:$0xf0] %v73_v18 }
  0x80   :  { %v71_v19 = vpop.permute.xlu1 %70  ;;  %v69_v20 = vpop.permute.xlu0 %68 }
  0x81   :  { %v74_v21 = vsel %vm2822_vm2, %v67_v16, %v69_v20  ;;  %v75_v22 = vsel %vm2822_vm2, %v69_v20, %v71_v19  ;;  %vm285_vm2 = vcmp.ne.f32.partialorder %v265_v47, 0.0 }
  0x82   :  { %83 = vst [vmem:[#allocation3 + $0x10] sm:$0xf0] %v74_v21  ;;  %84 = vst [vmem:[#allocation3 + $0x18] sm:$0xf0] %v75_v22  ;;  %v270_v21 = vld [vmem:[%s2814_s3 + $0x58] sm:$0xff] }
  0x83   :  { %v274_v22 = vld [vmem:[%s2814_s3 + $0x78] sm:$0xff] }
  0x84   :  { %v94_v23 = vpop.permute.xlu1 %93  ;;  %v92_v24 = vpop.permute.xlu0 %91  ;;  %v299_v53 = vld [vmem:[#allocation3] sm:$0xff] }
  0x85   :  { %v100_v25 = vsel %vm2820_vm4, %v92_v24, %v94_v23  ;;  %108 = vst.msk [vmem:[#allocation3 + $0x20] sm:$0xf] %vm2821_vm5, %v92_v24  ;;  %v300_v49 = vld [vmem:[#allocation3 + $0x8] sm:$0xff]  ;;  %vm281_vm5 = vcmp.ne.f32.partialorder %v261_v46, 0.0 }
  0x86   :  { %109 = vst [vmem:[#allocation3 + $0x28] sm:$0xf] %v100_v25  ;;  %v267_v25 = vld [vmem:[%s2814_s3 + $0x40] sm:$0xff] }
  0x88   :  { %v98_v26 = vpop.permute.xlu1 %97  ;;  %v96_v27 = vpop.permute.xlu0 %95 }
  0x89   :  { %v101_v28 = vsel %vm2820_vm4, %v94_v23, %v96_v27  ;;  %v102_v29 = vsel %vm2820_vm4, %v96_v27, %v98_v26  ;;  %vm2254_vm4 = vmpackc.low %vm283_vm12, %vm279_vm11  ;;  %v302_v58 = vld [vmem:[#allocation3 + $0x18] sm:$0xff]  ;;  %v301_v62 = vld [vmem:[#allocation3 + $0x10] sm:$0xff]  ;;  %vm2823_vm12 = vcmask 1039364  }
  0x8a   :  { %110 = vst [vmem:[#allocation3 + $0x30] sm:$0xf] %v101_v28  ;;  %111 = vst [vmem:[#allocation3 + $0x38] sm:$0xf] %v102_v29  ;;  %v271_v26 = vld [vmem:[%s2814_s3 + $0x60] sm:$0xff]  ;;  %v269_v29 = vld [vmem:[%s2814_s3 + $0x50] sm:$0xff] }
  0x8b   :  { %vm2269_vm11 = vmpackc.low %vm285_vm2, %vm281_vm5  ;;  %vm2824_vm2 = vcmask 920576   ;;  %vm288_vm5 = vcmp.ne.f32.partialorder %v268_v7, 0.0 }
  0x8c   :  { %v121_v30 = vpop.permute.xlu1 %120  ;;  %v119_v31 = vpop.permute.xlu0 %118  ;;  %vm2290_vm15 = vmpackc.low %vm292_vm14, %vm288_vm5  ;;  %vm2836_vm5 = vcmask 908288   ;;  %vm290_vm14 = vcmp.ne.f32.partialorder %v270_v21, 0.0 }
  0x8d   :  { %v127_v32 = vsel %vm2819_vm6, %v119_v31, %v121_v30  ;;  %135 = vst.msk [vmem:[#allocation3 + $0x20] sm:$0xf0] %vm2831_vm7, %v119_v31 }
  0x8e   :  { %136 = vst [vmem:[#allocation3 + $0x28] sm:$0xf0] %v127_v32 }
  0x90   :  { %v125_v35 = vpop.permute.xlu1 %124  ;;  %v123_v36 = vpop.permute.xlu0 %122 }
  0x91   :  { %v128_v39 = vsel %vm2819_vm6, %v121_v30, %v123_v36  ;;  %v129_v40 = vsel %vm2819_vm6, %v123_v36, %v125_v35  ;;  %vm2825_vm6 = vcmask 924672   ;;  %v273_v30 = vld [vmem:[%s2814_s3 + $0x70] sm:$0xff]  ;;  %v1482_v35 = vld [vmem:[%s2815_s4 + $0x88] sm:$0xff] }
  0x92   :  { %137 = vst [vmem:[#allocation3 + $0x30] sm:$0xf0] %v128_v39  ;;  %138 = vst [vmem:[#allocation3 + $0x38] sm:$0xf0] %v129_v40  ;;  %vm293_vm1 = vcmp.ne.f32.partialorder %v273_v30, 0.0 }
  0x94   :  { %v162_v43 = vpop.permute.xlu1 %161  ;;  %v160_v44 = vpop.permute.xlu0 %159  ;;  %v303_v45 = vld [vmem:[#allocation3 + $0x20] sm:$0xff] }
  0x95   :  { %v167_v48 = vsel %vm2826_vm8, %v160_v44, %v162_v43  ;;  %v304_v50 = vld [vmem:[#allocation3 + $0x28] sm:$0xff]  ;;  %v1937_v55 = vpack.c.bf16 %v303_v45, %v299_v53  ;;  %v275_v53 = vld [vmem:[%s2814_s3 + $0x80] sm:$0xf] }
  0x96   :  { %174 = vst [vmem:[#allocation3 + $0x48] sm:$0xf0] %v167_v48  ;;  %v1934_v52 = vpack.c.bf16 %v304_v50, %v300_v49 }
  0x98   :  { %v189_v56 = vpop.permute.xlu1 %188  ;;  %1936 = vmatprep.subr.msk.bf16.mxu0 %vm2248_vm13, %v1934_v52  ;;  %v187_v57 = vpop.permute.xlu0 %186  ;;  %v278_v52 = vld [vmem:[%s2814_s3 + $0x98] sm:$0xf] }
  0x99   :  { %v194_v60 = vsel %vm2825_vm6, %v187_v57, %v189_v56  ;;  %1939 = vmatpush1.bf16.msk.msra.mxu0 %vm2254_vm4, %v1937_v55  ;;  %v306_v61 = vld [vmem:[#allocation3 + $0x38] sm:$0xff]  ;;  %v305_v63 = vld [vmem:[#allocation3 + $0x30] sm:$0xff] }
  0x9a   :  { %201 = vst [vmem:[#allocation3 + $0x68] sm:$0xf] %v194_v60  ;;  %v1946_v0 = vpack.c.bf16 %v306_v61, %v302_v58  ;;  %v1949_v1 = vpack.c.bf16 %v305_v63, %v301_v62  ;;  %v277_v55 = vld [vmem:[%s2814_s3 + $0x90] sm:$0xf]  ;;  %v339_v60 = vld [vmem:[%s2812_s1] sm:$0xf] }
  0x9c   :  { %v216_v3 = vpop.permute.xlu1 %215  ;;  %1948 = vmatprep.subr.msk.bf16.mxu1 %vm2260_vm9, %v1946_v0  ;;  %v214_v4 = vpop.permute.xlu0 %213 }
  0x9d   :  { %v221_v5 = vsel %vm2829_vm10, %v214_v4, %v216_v3  ;;  %1951 = vmatpush1.bf16.msk.msra.mxu1 %vm2269_vm11, %v1949_v1  ;;  %v308_v17 = vld [vmem:[#allocation3 + $0x48] sm:$0xff] }
  0x9e   :  { %228 = vst [vmem:[#allocation3 + $0x68] sm:$0xf0] %v221_v5 }
  0xa0   :  { %v164_v9 = vpop.permute.xlu1 %163  ;;  %v158_v10 = vpop.permute.xlu0 %157 }
  0xa1   :  { %v168_v11 = vsel %vm2826_vm8, %v162_v43, %v164_v9  ;;  %177 = vst.msk [vmem:[#allocation3 + $0x58] sm:$0xf0] %vm2823_vm12, %v164_v9  ;;  %v166_v12 = vsel %vm2826_vm8, %v158_v10, %v160_v44  ;;  %vm2827_vm12 = vcmask 916484   ;;  %vm291_vm8 = vcmp.ne.f32.partialorder %v271_v26, 0.0 }
  0xa2   :  { %175 = vst [vmem:[#allocation3 + $0x50] sm:$0xf0] %v168_v11  ;;  %173 = vst [vmem:[#allocation3 + $0x40] sm:$0xf0] %v166_v12 }
  0xa4   :  { %v191_v13 = vpop.permute.xlu1 %190  ;;  %v185_v14 = vpop.permute.xlu0 %184 }
  0xa5   :  { %v195_v15 = vsel %vm2825_vm6, %v189_v56, %v191_v13  ;;  %204 = vst.msk [vmem:[#allocation3 + $0x78] sm:$0xf] %vm2824_vm2, %v191_v13  ;;  %v193_v16 = vsel %vm2825_vm6, %v185_v14, %v187_v57  ;;  %v312_v18 = vld [vmem:[#allocation3 + $0x68] sm:$0xff]  ;;  %vm294_vm2 = vcmp.ne.f32.partialorder %v274_v22, 0.0  ;;  %vm287_vm6 = vcmp.ne.f32.partialorder %v267_v25, 0.0 }
  0xa6   :  { %202 = vst [vmem:[#allocation3 + $0x70] sm:$0xf] %v195_v15  ;;  %200 = vst [vmem:[#allocation3 + $0x60] sm:$0xf] %v193_v16  ;;  %v1940_v20 = vpack.c.bf16 %v312_v18, %v308_v17 }
  0xa7   :  { %vm2322_vm7 = vmpackc.low %vm291_vm8, %vm287_vm6  ;;  %vm2834_vm6 = vcmask 1043456   ;;  %vm298_vm8 = vcmp.ne.f32.partialorder %v278_v52, 0.0 }
  0xa8   :  { %v218_v23 = vpop.permute.xlu1 %217  ;;  %v212_v24 = vpop.permute.xlu0 %211  ;;  %1942 = vmatprep.subr.msk.bf16.mxu0 %vm2290_vm15, %v1940_v20  ;;  %v310_v40 = vld [vmem:[#allocation3 + $0x58] sm:$0xff] }
  0xa9   :  { %v222_v27 = vsel %vm2829_vm10, %v216_v3, %v218_v23  ;;  %231 = vst.msk [vmem:[#allocation3 + $0x78] sm:$0xf0] %vm2827_vm12, %v218_v23  ;;  %v220_v28 = vsel %vm2829_vm10, %v212_v24, %v214_v4  ;;  %vm289_vm12 = vcmp.ne.f32.partialorder %v269_v29, 0.0  ;;  %vm2318_vm10 = vmpackc.low %vm294_vm2, %vm290_vm14  ;;  %v307_v42 = vld [vmem:[#allocation3 + $0x40] sm:$0xff]  ;;  %v309_v47 = vld [vmem:[#allocation3 + $0x50] sm:$0xff]  ;;  %vm297_vm2 = vcmp.ne.f32.partialorder %v277_v55, 0.0 }
  0xaa   :  { %229 = vst [vmem:[#allocation3 + $0x70] sm:$0xf0] %v222_v27  ;;  %227 = vst [vmem:[#allocation3 + $0x60] sm:$0xf0] %v220_v28  ;;  %vm2833_vm14 = vcmask 293888  }
  0xab   :  { %vm2326_vm3 = vmpackc.low %vm293_vm1, %vm289_vm12  ;;  %vm296_vm1 = vcmp.ne.f32.partialorder %v276_v37, 0.0  ;;  %vm295_vm12 = vcmp.ne.f32.partialorder %v275_v53, 0.0  ;;  %v1798_v24 = vld [vmem:[%s2813_s2 + $0x4] sm:$0xf] }
  0xac   :  { %v243_v31 = vpop.permute.xlu1 %242  ;;  %v241_v32 = vpop.permute.xlu0 %240 }
  0xad   :  { %v248_v33 = vsel %vm2836_vm5, %v241_v32, %v243_v31 }
  0xae   :  { %255 = vst [vmem:[#allocation3 + $0x88] sm:$0xf] %v248_v33 }
  0xb0   :  { %v245_v38 = vpop.permute.xlu1 %244  ;;  %v239_v39 = vpop.permute.xlu0 %238  ;;  %v314_v41 = vld [vmem:[#allocation3 + $0x78] sm:$0xff] }
  0xb1   :  { %v249_v43 = vsel %vm2836_vm5, %v243_v31, %v245_v38  ;;  %258 = vst.msk [vmem:[#allocation3 + $0x98] sm:$0xf] %vm2835_vm0, %v245_v38  ;;  %v247_v44 = vsel %vm2836_vm5, %v239_v39, %v241_v32  ;;  %v1952_v45 = vpack.c.bf16 %v314_v41, %v310_v40  ;;  %v311_v46 = vld [vmem:[#allocation3 + $0x60] sm:$0xff]  ;;  %v313_v48 = vld [vmem:[#allocation3 + $0x70] sm:$0xff] }
  0xb2   :  { %256 = vst [vmem:[#allocation3 + $0x90] sm:$0xf] %v249_v43  ;;  %254 = vst [vmem:[#allocation3 + $0x80] sm:$0xf] %v247_v44  ;;  %v1943_v49 = vpack.c.bf16 %v311_v46, %v307_v42  ;;  %v1955_v50 = vpack.c.bf16 %v313_v48, %v309_v47 }
  0xb3   :  { %1954 = vmatprep.subr.msk.bf16.mxu1 %vm2318_vm10, %v1952_v45 }
  0xb4   :  { %1945 = vmatpush1.bf16.msk.msra.mxu0 %vm2322_vm7, %v1943_v49  ;;  %1957 = vmatpush1.bf16.msk.msra.mxu1 %vm2326_vm3, %v1955_v50 }
  0xb5   :  { %v316_v56 = vld [vmem:[#allocation3 + $0x88] sm:$0xf] }
  0xb6   :  { %v336_v57 = vsel %vm296_vm1, %v316_v56, 0.0  ;;  %vm2853_vm1 = vcmask 1047684  }
  0xb7   :  { %1783 = vmatprep.subr.msk.mxu0 %vm2834_vm6, %v336_v57 }
  0xb8   :  { %v318_v58 = vld [vmem:[#allocation3 + $0x98] sm:$0xf] }
  0xb9   :  { %v338_v61 = vsel %vm298_vm8, %v318_v58, 0.0  ;;  %v315_v62 = vld [vmem:[#allocation3 + $0x80] sm:$0xf]  ;;  %v317_v63 = vld [vmem:[#allocation3 + $0x90] sm:$0xf]  ;;  %vm2854_vm8 = vcmask 1047564  }
  0xba   :  { %1794 = vmatprep.subr.msk.mxu1 %vm2834_vm6, %v338_v61  ;;  %v335_v0 = vsel %vm295_vm12, %v315_v62, 0.0  ;;  %v337_v1 = vsel %vm297_vm2, %v317_v63, 0.0  ;;  %vm2855_vm12 = vcmask 1043592   ;;  %vm2856_vm2 = vcmask 138240  }
  0xbb   :  { %1784 = vmatpush1.msk.msra.mxu0 %vm2834_vm6, %v335_v0  ;;  %1795 = vmatpush1.msk.msra.mxu1 %vm2834_vm6, %v337_v1 }
  0xbc   :  { %1785 = vmatmul.mubr.msk.f32.vlgmr.msra.gmra.mrb[0].mxu0 %vm2833_vm14, %v339_v60  ;;  %1796 = vmatmul.mubr.msk.f32.vlgmr.msra.gmra.mrb[0].mxu1 %vm2833_vm14, %v339_v60  ;;  %vm2857_vm14 = vcmask 130048  }
  0xbd   :  { %899 = vmatprep.mubr.f32.mxu0 %v2120_v6  ;;  %970 = vmatprep.mubr.f32.mxu1 %v2120_v6 }
  0xc1   :  { %v344_v3 = vpop.permute.xlu0 %343 }
 0x18f   :  { %v500_v4 = vpop.f32.mrb[0].mxu1  ;;  %v429_v5 = vpop.f32.mrb[0].mxu0 }
 0x190   :  { %v430_v7 = vadd.f32 %v429_v5, %v344_v3  ;;  %v431_v8 = vpop.f32.mrb[1].mxu0  ;;  %v501_v9 = vadd.f32 %v500_v4, %v344_v3  ;;  %v502_v10 = vpop.f32.mrb[1].mxu1 }
 0x191   :  { %v432_v11 = vadd.f32 %v431_v8, %v344_v3  ;;  %v503_v12 = vadd.f32 %v502_v10, %v344_v3 }
 0x192   :  { %v505_v13 = vmax.f32 %v430_v7, 0.0  ;;  %v507_v14 = vmax.f32 %v501_v9, 0.0 }
 0x193   :  { %v506_v15 = vmax.f32 %v432_v11, 0.0  ;;  %v508_v16 = vmax.f32 %v503_v12, 0.0 }
 0x194   :  { %v1849_v17 = vcombine.low %v505_v13, %v505_v13  ;;  %v1850_v18 = vcombine.low %v507_v14, %v507_v14 }
 0x195   :  { %v513_v20 = vcombine.low %v505_v13, %v506_v15  ;;  %v1847_v21 = vcombine.low %v506_v15, %v506_v15  ;;  %v514_v22 = vcombine.low %v507_v14, %v508_v16  ;;  %v1848_v23 = vcombine.low %v508_v16, %v508_v16 }
 0x196   :  { %641 = vrot.lane.b32.xlu1 %v1850_v18, %s2116_s8  ;;  %550 = vrot.lane.b32.xlu0 %v1849_v17, %s2113_s29 }
 0x197   :  { %627 = vst [vmem:[#allocation3 + $0x40] sm:$0xf] %v513_v20  ;;  %628 = vst [vmem:[#allocation3 + $0x48] sm:$0xf] %v1847_v21 }
 0x198   :  { %629 = vst [vmem:[#allocation3 + $0x50] sm:$0xf] %v514_v22  ;;  %630 = vst [vmem:[#allocation3 + $0x58] sm:$0xf] %v1848_v23 }
 0x19a   :  { %691 = vrot.lane.b32.xlu1 %v1850_v18, %s2118_s10  ;;  %554 = vrot.lane.b32.xlu0 %v1850_v18, %s2113_s29 }
 0x19e   :  { %600 = vrot.lane.b32.xlu0 %v1849_v17, %s2115_s30  ;;  %525 = vrot.lane.b32.xlu1 %v513_v20, %s2112_s28 }
 0x1a2   :  { %604 = vrot.lane.b32.xlu0 %v1850_v18, %s2115_s30  ;;  %527 = vrot.lane.b32.xlu1 %v1847_v21, %s2112_s28 }
 0x1a6   :  { %637 = vrot.lane.b32.xlu0 %v1849_v17, %s2116_s8  ;;  %531 = vrot.lane.b32.xlu1 %v1848_v23, %s2112_s28 }
 0x1aa   :  { %687 = vrot.lane.b32.xlu0 %v1849_v17, %s2118_s10  ;;  %552 = vrot.lane.b32.xlu1 %v513_v20, %s2113_s29 }
 0x1ae   :  { %529 = vrot.lane.b32.xlu0 %v514_v22, %s2112_s28  ;;  %556 = vrot.lane.b32.xlu1 %v514_v22, %s2113_s29 }
 0x1b2   :  { %575 = vrot.lane.b32.xlu0 %v513_v20, %s2114_s0  ;;  %577 = vrot.lane.b32.xlu1 %v1847_v21, %s2114_s0 }
 0x1b6   :  { %579 = vrot.lane.b32.xlu0 %v514_v22, %s2114_s0  ;;  %581 = vrot.lane.b32.xlu1 %v1848_v23, %s2114_s0 }
 0x1ba   :  { %639 = vrot.lane.b32.xlu0 %v513_v20, %s2116_s8  ;;  %602 = vrot.lane.b32.xlu1 %v513_v20, %s2115_s30 }
 0x1be   :  { %664 = vrot.lane.b32.xlu0 %v1847_v21, %s2117_s9  ;;  %606 = vrot.lane.b32.xlu1 %v514_v22, %s2115_s30 }
 0x1c2   :  { %689 = vrot.lane.b32.xlu0 %v513_v20, %s2118_s10  ;;  %666 = vrot.lane.b32.xlu1 %v514_v22, %s2117_s9 }
 0x1c6   :  { %662 = vrot.lane.b32.xlu0 %v513_v20, %s2117_s9  ;;  %643 = vrot.lane.b32.xlu1 %v514_v22, %s2116_s8 }
 0x1ca   :  { %714 = vrot.lane.b32.xlu0 %v1847_v21, %s2119_s11  ;;  %668 = vrot.lane.b32.xlu1 %v1848_v23, %s2117_s9 }
 0x1ce   :  { %712 = vrot.lane.b32.xlu0 %v513_v20, %s2119_s11  ;;  %693 = vrot.lane.b32.xlu1 %v514_v22, %s2118_s10 }
 0x1d2   :  { %817 = vperm.xlu0 %2082, %v1798_v24   ;;  %716 = vrot.lane.b32.xlu1 %v514_v22, %s2119_s11 }
 0x1d6   :  { %718 = vrot.lane.b32.xlu1 %v1848_v23, %s2119_s11 }
 0x208   :  { %v2397_v25 = vpop.permute.xlu1 %641  ;;  %v551_v26 = vpop.permute.xlu0 %550 }
 0x209   :  { %565 = vst.msk [vmem:[#allocation3] sm:$0xf0] %vm2853_vm1, %v551_v26  ;;  %vm2858_vm1 = vmmov %vm2857_vm14 }
 0x20a   :  { %vm2861_vm6 = vmmov %vm2858_vm1 }
 0x20c   :  { %v2400_v27 = vpop.permute.xlu1 %691  ;;  %v555_v28 = vpop.permute.xlu0 %554 }
 0x210   :  { %v601_v29 = vpop.permute.xlu0 %600  ;;  %v526_v30 = vpop.permute.xlu1 %525 }
 0x211   :  { %615 = vst.msk [vmem:[#allocation3 + $0x20] sm:$0xf0] %vm2854_vm8, %v601_v29  ;;  %vm2859_vm8 = vmmov %vm2856_vm2 }
 0x212   :  { %540 = vst.msk [vmem:[#allocation3] sm:$0xf] %vm2855_vm12, %v526_v30  ;;  %vm2860_vm12 = vmmov %vm2856_vm2 }
 0x214   :  { %v605_v31 = vpop.permute.xlu0 %604  ;;  %v528_v32 = vpop.permute.xlu1 %527 }
 0x215   :  { %v533_v33 = vsel %vm2856_vm2, %v526_v30, %v528_v32  ;;  %vm2862_vm2 = vcmask 1043576  }
 0x216   :  { %541 = vst [vmem:[#allocation3 + $0x8] sm:$0xf] %v533_v33 }
 0x218   :  { %v638_v37 = vpop.permute.xlu0 %637  ;;  %v532_v38 = vpop.permute.xlu1 %531 }
 0x219   :  { %v771_v14 = vld [vmem:[#allocation3] sm:$0xff] }
 0x21c   :  { %v688_v39 = vpop.permute.xlu0 %687  ;;  %v553_v40 = vpop.permute.xlu1 %552 }
 0x21d   :  { %v558_v41 = vsel %vm2857_vm14, %v551_v26, %v553_v40  ;;  %v559_v42 = vsel %vm2858_vm1, %v553_v40, %v555_v28  ;;  %vm2863_vm14 = vcmask 121856  }
 0x21e   :  { %566 = vst [vmem:[#allocation3 + $0x8] sm:$0xf0] %v558_v41  ;;  %567 = vst [vmem:[#allocation3 + $0x10] sm:$0xf0] %v559_v42 }
 0x21f   :  { %vm2864_vm1 = vmmov %vm2863_vm14 }
 0x220   :  { %v530_v43 = vpop.permute.xlu0 %529  ;;  %v557_v44 = vpop.permute.xlu1 %556  ;;  %vm2865_vm0 = vmmov %vm2864_vm1 }
 0x221   :  { %v534_v45 = vsel %vm2859_vm8, %v528_v32, %v530_v43  ;;  %v535_v46 = vsel %vm2860_vm12, %v530_v43, %v532_v38  ;;  %v560_v47 = vsel %vm2861_vm6, %v555_v28, %v557_v44  ;;  %vm2866_vm6 = vcmask 1039360  }
 0x222   :  { %542 = vst [vmem:[#allocation3 + $0x10] sm:$0xf] %v534_v45  ;;  %543 = vst [vmem:[#allocation3 + $0x18] sm:$0xf] %v535_v46  ;;  %vm2868_vm12 = vcmask 7168  }
 0x223   :  { %568 = vst [vmem:[#allocation3 + $0x18] sm:$0xf0] %v560_v47  ;;  %vm2867_vm8 = vmmov %vm2866_vm6 }
 0x224   :  { %v576_v48 = vpop.permute.xlu0 %575  ;;  %v578_v49 = vpop.permute.xlu1 %577 }
 0x225   :  { %590 = vst.msk [vmem:[#allocation3 + $0x20] sm:$0xf] %vm2862_vm2, %v576_v48  ;;  %v583_v50 = vsel %vm2863_vm14, %v576_v48, %v578_v49  ;;  %vm2869_vm2 = vmmov %vm2868_vm12  ;;  %vm2871_vm14 = vcmask 916480   ;;  %v772_v11 = vld [vmem:[#allocation3 + $0x8] sm:$0xff] }
 0x226   :  { %591 = vst [vmem:[#allocation3 + $0x28] sm:$0xf] %v583_v50 }
 0x228   :  { %v580_v52 = vpop.permute.xlu0 %579  ;;  %v582_v53 = vpop.permute.xlu1 %581 }
 0x229   :  { %v584_v55 = vsel %vm2864_vm1, %v578_v49, %v580_v52  ;;  %v585_v56 = vsel %vm2865_vm0, %v580_v52, %v582_v53  ;;  %vm2870_vm0 = vmmov %vm2869_vm2  ;;  %v773_v26 = vld [vmem:[#allocation3 + $0x10] sm:$0xff]  ;;  %v747_v53 = vld [vmem:[%s2814_s3 + $0x80] sm:$0xf] }
 0x22a   :  { %592 = vst [vmem:[#allocation3 + $0x30] sm:$0xf] %v584_v55  ;;  %593 = vst [vmem:[#allocation3 + $0x38] sm:$0xf] %v585_v56  ;;  %v774_v22 = vld [vmem:[#allocation3 + $0x18] sm:$0xff] }
 0x22b   :  { %vm2872_vm1 = vmmov %vm2871_vm14  ;;  %v750_v56 = vld [vmem:[%s2814_s3 + $0x98] sm:$0xf] }
 0x22c   :  { %v640_v57 = vpop.permute.xlu0 %639  ;;  %v603_v58 = vpop.permute.xlu1 %602  ;;  %v775_v7 = vld [vmem:[#allocation3 + $0x20] sm:$0xff] }
 0x22d   :  { %v645_v60 = vsel %vm2866_vm6, %v638_v37, %v640_v57  ;;  %v646_v61 = vsel %vm2867_vm8, %v640_v57, %v2397_v25  ;;  %v608_v62 = vsel %vm2868_vm12, %v601_v29, %v603_v58  ;;  %v609_v63 = vsel %vm2869_vm2, %v603_v58, %v605_v31  ;;  %v749_v58 = vld [vmem:[%s2814_s3 + $0x90] sm:$0xf] }
 0x22e   :  { %652 = vst [vmem:[#allocation3 + $0x40] sm:$0xf0] %v645_v60  ;;  %653 = vst [vmem:[#allocation3 + $0x48] sm:$0xf0] %v646_v61  ;;  %vm2873_vm6 = vcmask 924672   ;;  %v1961_v15 = vpack.c.bf16 %v775_v7, %v771_v14  ;;  %vm2875_vm12 = vcmask 1039360  }
 0x22f   :  { %616 = vst [vmem:[#allocation3 + $0x28] sm:$0xf0] %v608_v62  ;;  %617 = vst [vmem:[#allocation3 + $0x30] sm:$0xf0] %v609_v63  ;;  %vm2876_vm2 = vcmask 1039364  }
 0x230   :  { %v665_v0 = vpop.permute.xlu0 %664  ;;  %v607_v1 = vpop.permute.xlu1 %606  ;;  %vm2874_vm8 = vmmov %vm2873_vm6  ;;  %v1797_v62 = vld [vmem:[%s2812_s1 + $0x4] sm:$0xf]  ;;  %s2123_s1 = smov [#allocation4]  }
 0x231   :  { %v610_v3 = vsel %vm2870_vm0, %v605_v31, %v607_v1  ;;  %vm2877_vm0 = vmmov %vm2873_vm6 }
 0x232   :  { %618 = vst [vmem:[#allocation3 + $0x38] sm:$0xf0] %v610_v3 }
 0x234   :  { %v690_v4 = vpop.permute.xlu0 %689  ;;  %v667_v5 = vpop.permute.xlu1 %666 }
 0x235   :  { %v695_v8 = vsel %vm2871_vm14, %v688_v39, %v690_v4  ;;  %v696_v9 = vsel %vm2872_vm1, %v690_v4, %v2400_v27  ;;  %v671_v10 = vsel %vm2873_vm6, %v665_v0, %v667_v5  ;;  %vm2878_vm14 = vcmask 920576   ;;  %v779_v40 = vld [vmem:[#allocation3 + $0x40] sm:$0xff] }
 0x236   :  { %v776_v12 = vld [vmem:[#allocation3 + $0x28] sm:$0xff]  ;;  %702 = vst [vmem:[#allocation3 + $0x60] sm:$0xf0] %v695_v8  ;;  %703 = vst [vmem:[#allocation3 + $0x68] sm:$0xf0] %v696_v9  ;;  %v777_v18 = vld [vmem:[#allocation3 + $0x30] sm:$0xff] }
 0x237   :  { %678 = vst [vmem:[#allocation3 + $0x68] sm:$0xf] %v671_v10  ;;  %v1958_v13 = vpack.c.bf16 %v776_v12, %v772_v11  ;;  %v1973_v28 = vpack.c.bf16 %v777_v18, %v773_v26  ;;  %vm2881_vm6 = vcmask 904192  }
 0x238   :  { %v663_v16 = vpop.permute.xlu0 %662  ;;  %v644_v17 = vpop.permute.xlu1 %643 }
 0x239   :  { %1960 = vmatprep.subr.msk.bf16.mxu0 %vm2248_vm13, %v1958_v13  ;;  %v670_v20 = vsel %vm2874_vm8, %v663_v16, %v665_v0  ;;  %v647_v21 = vsel %vm2875_vm12, %v2397_v25, %v644_v17  ;;  %655 = vst.msk [vmem:[#allocation3 + $0x58] sm:$0xf0] %vm2876_vm2, %v644_v17  ;;  %v778_v23 = vld [vmem:[#allocation3 + $0x38] sm:$0xff]  ;;  %v780_v25 = vld [vmem:[#allocation3 + $0x48] sm:$0xff]  ;;  %vm767_vm12 = vcmp.ne.f32.partialorder %v747_v53, 0.0  ;;  %vm770_vm2 = vcmp.ne.f32.partialorder %v750_v56, 0.0 }
 0x23a   :  { %1963 = vmatpush1.bf16.msk.msra.mxu0 %vm2254_vm4, %v1961_v15  ;;  %677 = vst [vmem:[#allocation3 + $0x60] sm:$0xf] %v670_v20  ;;  %654 = vst [vmem:[#allocation3 + $0x50] sm:$0xf0] %v647_v21  ;;  %v1970_v24 = vpack.c.bf16 %v778_v23, %v774_v22 }
 0x23c   :  { %v715_v29 = vpop.permute.xlu0 %714  ;;  %1972 = vmatprep.subr.msk.bf16.mxu1 %vm2260_vm9, %v1970_v24  ;;  %v669_v30 = vpop.permute.xlu1 %668  ;;  %vm2879_vm9 = vmmov %vm2872_vm1  ;;  %vm2880_vm1 = vcmask 916484  }
 0x23d   :  { %v672_v31 = vsel %vm2877_vm0, %v667_v5, %v669_v30  ;;  %680 = vst.msk [vmem:[#allocation3 + $0x78] sm:$0xf] %vm2878_vm14, %v669_v30  ;;  %1975 = vmatpush1.bf16.msk.msra.mxu1 %vm2269_vm11, %v1973_v28  ;;  %vm2882_vm0 = vcmask 1043456   ;;  %vm769_vm14 = vcmp.ne.f32.partialorder %v749_v58, 0.0  ;;  %v1676_v28 = vld [vmem:[%s2817_s6] sm:$0x3] }
 0x23e   :  { %v784_v32 = vld [vmem:[#allocation3 + $0x68] sm:$0xff]  ;;  %679 = vst [vmem:[#allocation3 + $0x70] sm:$0xf] %v672_v31 }
 0x23f   :  { %v1964_v33 = vpack.c.bf16 %v784_v32, %v780_v25 }
 0x240   :  { %v713_v37 = vpop.permute.xlu0 %712  ;;  %v694_v38 = vpop.permute.xlu1 %693  ;;  %v782_v46 = vld [vmem:[#allocation3 + $0x58] sm:$0xff] }
 0x241   :  { %1966 = vmatprep.subr.msk.bf16.mxu0 %vm2290_vm15, %v1964_v33  ;;  %v720_v59 = vsel %vm2836_vm5, %v713_v37, %v715_v29  ;;  %v697_v39 = vsel %vm2879_vm9, %v2400_v27, %v694_v38  ;;  %705 = vst.msk [vmem:[#allocation3 + $0x78] sm:$0xf0] %vm2880_vm1, %v694_v38  ;;  %v783_v41 = vld [vmem:[#allocation3 + $0x60] sm:$0xff]  ;;  %v748_v27 = vld [vmem:[%s2814_s3 + $0x88] sm:$0xf]  ;;  %v781_v50 = vld [vmem:[#allocation3 + $0x50] sm:$0xff] }
 0x242   :  { %727 = vst [vmem:[#allocation3 + $0x80] sm:$0xf] %v720_v59  ;;  %704 = vst [vmem:[#allocation3 + $0x70] sm:$0xf0] %v697_v39  ;;  %v1967_v42 = vpack.c.bf16 %v783_v41, %v779_v40  ;;  %vm768_vm8 = vcmp.ne.f32.partialorder %v748_v27, 0.0  ;;  %vm2884_vm1 = vcmask 293888  }
 0x243   :  { %vm2883_vm9 = vmmov %vm2882_vm0 }
 0x244   :  { %v717_v43 = vpop.permute.xlu1 %716  ;;  %1969 = vmatpush1.bf16.msk.msra.mxu0 %vm2322_vm7, %v1967_v42 }
 0x245   :  { %v721_v44 = vsel %vm2836_vm5, %v715_v29, %v717_v43  ;;  %v1822_v29 = vld [vmem:[%s2813_s2 + $0x8] sm:$0xf] }
 0x246   :  { %728 = vst [vmem:[#allocation3 + $0x88] sm:$0xf] %v721_v44 }
 0x248   :  { %v719_v45 = vpop.permute.xlu1 %718  ;;  %v786_v47 = vld [vmem:[#allocation3 + $0x78] sm:$0xff] }
 0x249   :  { %v722_v48 = vsel %vm2836_vm5, %v717_v43, %v719_v45  ;;  %730 = vst.msk [vmem:[#allocation3 + $0x98] sm:$0xf] %vm2881_vm6, %v719_v45  ;;  %v1976_v49 = vpack.c.bf16 %v786_v47, %v782_v46  ;;  %v785_v52 = vld [vmem:[#allocation3 + $0x70] sm:$0xff]  ;;  %v787_v57 = vld [vmem:[#allocation3 + $0x80] sm:$0xf]  ;;  %vm2885_vm6 = vmmov %vm2882_vm0 }
 0x24a   :  { %729 = vst [vmem:[#allocation3 + $0x90] sm:$0xf] %v722_v48  ;;  %v1979_v55 = vpack.c.bf16 %v785_v52, %v781_v50  ;;  %v807_v63 = vsel %vm767_vm12, %v787_v57, 0.0  ;;  %vm2887_vm5 = vmmov %vm2884_vm1  ;;  %vm2889_vm12 = vcmask 1047564  }
 0x24b   :  { %1978 = vmatprep.subr.msk.bf16.mxu1 %vm2318_vm10, %v1976_v49 }
 0x24c   :  { %1981 = vmatpush1.bf16.msk.msra.mxu1 %vm2326_vm3, %v1979_v55 }
 0x24d   :  { %v788_v60 = vld [vmem:[#allocation3 + $0x88] sm:$0xf] }
 0x24e   :  { %v808_v61 = vsel %vm768_vm8, %v788_v60, 0.0  ;;  %vm2886_vm8 = vmmov %vm2882_vm0 }
 0x24f   :  { %1807 = vmatprep.subr.msk.mxu0 %vm2882_vm0, %v808_v61 }
 0x250   :  { %1808 = vmatpush1.msk.msra.mxu0 %vm2883_vm9, %v807_v63  ;;  %v790_v0 = vld [vmem:[#allocation3 + $0x98] sm:$0xf]  ;;  %vm2893_vm9 = vcmask 138240  }
 0x251   :  { %1809 = vmatmul.mubr.msk.f32.vlgmr.msra.gmra.mrb[2].mxu0 %vm2884_vm1, %v1797_v62  ;;  %v810_v1 = vsel %vm770_vm2, %v790_v0, 0.0  ;;  %v789_v3 = vld [vmem:[#allocation3 + $0x90] sm:$0xf]  ;;  %v818_v5 = vpop.permute.xlu0 %817  ;;  %vm2890_vm2 = vcmask 130048   ;;  %vm2894_vm1 = vcmask 1043592  }
 0x252   :  { %1818 = vmatprep.subr.msk.mxu1 %vm2885_vm6, %v810_v1  ;;  %v809_v4 = vsel %vm769_vm14, %v789_v3, 0.0  ;;  %1371 = vmatprep.mubr.f32.mxu0 %v2120_v6  ;;  %vm2891_vm0 = vmmov %vm2890_vm2 }
 0x253   :  { %1819 = vmatpush1.msk.msra.mxu1 %vm2886_vm8, %v809_v4  ;;  %vm2892_vm14 = vmmov %vm2891_vm0 }
 0x254   :  { %1820 = vmatmul.mubr.msk.f32.vlgmr.msra.gmra.mrb[2].mxu1 %vm2887_vm5, %v1797_v62  ;;  %vm2888_vm5 = vcmask 1047684   ;;  %vm2895_vm6 = vmmov %vm2893_vm9 }
 0x255   :  { %1442 = vmatprep.mubr.f32.mxu1 %v2120_v6  ;;  %vm2896_vm8 = vmmov %vm2895_vm6 }
 0x324   :  { %v901_v7 = vpop.f32.mrb[2].mxu0 }
 0x325   :  { %v902_v8 = vadd.f32 %v901_v7, %v818_v5  ;;  %v903_v9 = vpop.f32.mrb[3].mxu0  ;;  %v1210_v7 = vld [vmem:[%s2814_s3 + $0x38] sm:$0xff] }
 0x326   :  { %v904_v10 = vadd.f32 %v903_v9, %v818_v5 }
 0x327   :  { %v977_v11 = vmax.f32 %v902_v8, 0.0  ;;  %v972_v12 = vpop.f32.mrb[2].mxu1 }
 0x328   :  { %v978_v13 = vmax.f32 %v904_v10, 0.0  ;;  %v973_v14 = vadd.f32 %v972_v12, %v818_v5  ;;  %v974_v15 = vpop.f32.mrb[3].mxu1 }
 0x329   :  { %v1853_v16 = vcombine.low %v977_v11, %v977_v11  ;;  %v975_v17 = vadd.f32 %v974_v15, %v818_v5  ;;  %v1206_v5 = vld [vmem:[%s2814_s3 + $0x18] sm:$0xff] }
 0x32a   :  { %v985_v18 = vcombine.low %v977_v11, %v978_v13  ;;  %v1851_v20 = vcombine.low %v978_v13, %v978_v13  ;;  %v979_v21 = vmax.f32 %v973_v14, 0.0 }
 0x32b   :  { %v980_v22 = vmax.f32 %v975_v17, 0.0  ;;  %1022 = vrot.lane.b32.xlu1 %v1853_v16, %s2113_s29 }
 0x32c   :  { %1099 = vst [vmem:[#allocation3 + $0x40] sm:$0xf] %v985_v18  ;;  %1100 = vst [vmem:[#allocation3 + $0x48] sm:$0xf] %v1851_v20  ;;  %v1854_v23 = vcombine.low %v979_v21, %v979_v21 }
 0x32d   :  { %v986_v24 = vcombine.low %v979_v21, %v980_v22  ;;  %v1852_v26 = vcombine.low %v980_v22, %v980_v22 }
 0x32e   :  { %1113 = vrot.lane.b32.xlu0 %v1854_v23, %s2116_s8 }
 0x32f   :  { %1101 = vst [vmem:[#allocation3 + $0x50] sm:$0xf] %v986_v24  ;;  %1102 = vst [vmem:[#allocation3 + $0x58] sm:$0xf] %v1852_v26  ;;  %1026 = vrot.lane.b32.xlu1 %v1854_v23, %s2113_s29 }
 0x332   :  { %1163 = vrot.lane.b32.xlu0 %v1854_v23, %s2118_s10 }
 0x333   :  { %1072 = vrot.lane.b32.xlu1 %v1853_v16, %s2115_s30 }
 0x336   :  { %999 = vrot.lane.b32.xlu0 %v1851_v20, %s2112_s28 }
 0x337   :  { %1076 = vrot.lane.b32.xlu1 %v1854_v23, %s2115_s30 }
 0x33a   :  { %1003 = vrot.lane.b32.xlu0 %v1852_v26, %s2112_s28 }
 0x33b   :  { %1109 = vrot.lane.b32.xlu1 %v1853_v16, %s2116_s8 }
 0x33e   :  { %1024 = vrot.lane.b32.xlu0 %v985_v18, %s2113_s29 }
 0x33f   :  { %1159 = vrot.lane.b32.xlu1 %v1853_v16, %s2118_s10 }
 0x342   :  { %1028 = vrot.lane.b32.xlu0 %v986_v24, %s2113_s29 }
 0x343   :  { %997 = vrot.lane.b32.xlu1 %v985_v18, %s2112_s28 }
 0x346   :  { %1049 = vrot.lane.b32.xlu0 %v1851_v20, %s2114_s0 }
 0x347   :  { %1001 = vrot.lane.b32.xlu1 %v986_v24, %s2112_s28 }
 0x34a   :  { %1053 = vrot.lane.b32.xlu0 %v1852_v26, %s2114_s0 }
 0x34b   :  { %1047 = vrot.lane.b32.xlu1 %v985_v18, %s2114_s0 }
 0x34e   :  { %1074 = vrot.lane.b32.xlu0 %v985_v18, %s2115_s30 }
 0x34f   :  { %1051 = vrot.lane.b32.xlu1 %v986_v24, %s2114_s0 }
 0x352   :  { %1078 = vrot.lane.b32.xlu0 %v986_v24, %s2115_s30 }
 0x353   :  { %1111 = vrot.lane.b32.xlu1 %v985_v18, %s2116_s8 }
 0x356   :  { %1138 = vrot.lane.b32.xlu0 %v986_v24, %s2117_s9 }
 0x357   :  { %1136 = vrot.lane.b32.xlu1 %v1851_v20, %s2117_s9 }
 0x35a   :  { %1115 = vrot.lane.b32.xlu0 %v986_v24, %s2116_s8 }
 0x35b   :  { %1161 = vrot.lane.b32.xlu1 %v985_v18, %s2118_s10 }
 0x35e   :  { %1140 = vrot.lane.b32.xlu0 %v1852_v26, %s2117_s9 }
 0x35f   :  { %1134 = vrot.lane.b32.xlu1 %v985_v18, %s2117_s9 }
 0x362   :  { %1165 = vrot.lane.b32.xlu0 %v986_v24, %s2118_s10  ;;  %s1767_s10 = sshll.u32 %s2123_s1, 4  ;;  %s1768_s10 = int_to_ptr.vmem [resolvable:$true] %s1767_s10 }
 0x363   :  { %1186 = vrot.lane.b32.xlu1 %v1851_v20, %s2119_s11  ;;  %p2093_p1 = scmp.lt.s32.totalorder %s1768_s10, %s1768_s10 }
 0x366   :  { %1188 = vrot.lane.b32.xlu0 %v986_v24, %s2119_s11 }
 0x367   :  { %1184 = vrot.lane.b32.xlu1 %v985_v18, %s2119_s11 }
 0x36a   :  { %1190 = vrot.lane.b32.xlu0 %v1852_v26, %s2119_s11  ;;  %s2088_s11 = scalar_lea.vmem %s1768_s10, 32 }
 0x36b   :  { %1289 = vperm.xlu1 %2083, %v1822_v29   ;;  %p2089_p0 = scmp.ne.s32.totalorder %s1768_s10, %s2088_s11  ;;  %p2094_p2 = scmp.lt.s32.totalorder %s2088_s11, %s2088_s11 }
 0x36d   :  { %p2095_p3 = por %p2094_p2, %p2093_p1 }
 0x36e   :  { %1679 = vperm.xlu0 %2082, %v1676_v28  }
 0x36f   :  { %p2096_p4 = pnand %p2095_p3, %p2089_p0 }
 0x39d   :  { %v1023_v30 = vpop.permute.xlu1 %1022 }
 0x39e   :  { %1037 = vst.msk [vmem:[#allocation3] sm:$0xf0] %vm2888_vm5, %v1023_v30  ;;  %vm2897_vm5 = vcmask 121856  }
 0x3a0   :  { %v2515_v31 = vpop.permute.xlu0 %1113 }
 0x3a1   :  { %v1027_v25 = vpop.permute.xlu1 %1026 }
 0x3a4   :  { %v2517_v32 = vpop.permute.xlu0 %1163 }
 0x3a5   :  { %v1073_v33 = vpop.permute.xlu1 %1072 }
 0x3a6   :  { %1087 = vst.msk [vmem:[#allocation3 + $0x20] sm:$0xf0] %vm2889_vm12, %v1073_v33  ;;  %vm2898_vm12 = vcmask 1043576  }
 0x3a8   :  { %v1000_v37 = vpop.permute.xlu0 %999 }
 0x3a9   :  { %v1077_v38 = vpop.permute.xlu1 %1076 }
 0x3ac   :  { %v1004_v59 = vpop.permute.xlu0 %1003 }
 0x3ad   :  { %v1110_v39 = vpop.permute.xlu1 %1109 }
 0x3b0   :  { %v1025_v40 = vpop.permute.xlu0 %1024 }
 0x3b1   :  { %v1030_v41 = vsel %vm2890_vm2, %v1023_v30, %v1025_v40  ;;  %v1031_v42 = vsel %vm2891_vm0, %v1025_v40, %v1027_v25  ;;  %v2522_v43 = vpop.permute.xlu1 %1159  ;;  %vm2899_vm2 = vcmask 7168  }
 0x3b2   :  { %1038 = vst [vmem:[#allocation3 + $0x8] sm:$0xf0] %v1030_v41  ;;  %1039 = vst [vmem:[#allocation3 + $0x10] sm:$0xf0] %v1031_v42 }
 0x3b3   :  { %vm2900_vm0 = vmmov %vm2899_vm2 }
 0x3b4   :  { %v1029_v44 = vpop.permute.xlu0 %1028 }
 0x3b5   :  { %v1032_v45 = vsel %vm2892_vm14, %v1027_v25, %v1029_v44  ;;  %v998_v46 = vpop.permute.xlu1 %997  ;;  %vm2901_vm14 = vmmov %vm2897_vm5 }
 0x3b6   :  { %1040 = vst [vmem:[#allocation3 + $0x18] sm:$0xf0] %v1032_v45  ;;  %v1005_v47 = vsel %vm2893_vm9, %v998_v46, %v1000_v37  ;;  %1012 = vst.msk [vmem:[#allocation3] sm:$0xf] %vm2894_vm1, %v998_v46 }
 0x3b7   :  { %1013 = vst [vmem:[#allocation3 + $0x8] sm:$0xf] %v1005_v47  ;;  %vm2902_vm9 = vmmov %vm2897_vm5 }
 0x3b8   :  { %v1050_v27 = vpop.permute.xlu0 %1049  ;;  %vm2903_vm1 = vmmov %vm2900_vm0 }
 0x3b9   :  { %v1002_v48 = vpop.permute.xlu1 %1001 }
 0x3ba   :  { %v1006_v49 = vsel %vm2895_vm6, %v1000_v37, %v1002_v48  ;;  %v1007_v50 = vsel %vm2896_vm8, %v1002_v48, %v1004_v59  ;;  %vm2904_vm6 = vcmask 1039360   ;;  %v1220_v48 = vld [vmem:[%s2814_s3 + $0x88] sm:$0xf] }
 0x3bb   :  { %1014 = vst [vmem:[#allocation3 + $0x10] sm:$0xf] %v1006_v49  ;;  %1015 = vst [vmem:[#allocation3 + $0x18] sm:$0xf] %v1007_v50 }
 0x3bc   :  { %v1054_v52 = vpop.permute.xlu0 %1053  ;;  %vm2905_vm8 = vmmov %vm2904_vm6 }
 0x3bd   :  { %v1048_v53 = vpop.permute.xlu1 %1047  ;;  %v1243_v15 = vld [vmem:[#allocation3] sm:$0xff] }
 0x3be   :  { %v1055_v55 = vsel %vm2897_vm5, %v1048_v53, %v1050_v27  ;;  %1062 = vst.msk [vmem:[#allocation3 + $0x20] sm:$0xf] %vm2898_vm12, %v1048_v53  ;;  %v1244_v11 = vld [vmem:[#allocation3 + $0x8] sm:$0xff]  ;;  %vm2906_vm5 = vcmask 924672   ;;  %vm1226_vm12 = vcmp.ne.f32.partialorder %v1206_v5, 0.0 }
 0x3bf   :  { %1063 = vst [vmem:[#allocation3 + $0x28] sm:$0xf] %v1055_v55  ;;  %v1219_v53 = vld [vmem:[%s2814_s3 + $0x80] sm:$0xf] }
 0x3c0   :  { %v1075_v56 = vpop.permute.xlu0 %1074 }
 0x3c1   :  { %v1080_v57 = vsel %vm2899_vm2, %v1073_v33, %v1075_v56  ;;  %v1081_v58 = vsel %vm2900_vm0, %v1075_v56, %v1077_v38  ;;  %v1052_v60 = vpop.permute.xlu1 %1051  ;;  %vm1230_vm2 = vcmp.ne.f32.partialorder %v1210_v7, 0.0  ;;  %vm2907_vm0 = vmmov %vm2904_vm6  ;;  %v1222_v56 = vld [vmem:[%s2814_s3 + $0x98] sm:$0xf] }
 0x3c2   :  { %1088 = vst [vmem:[#allocation3 + $0x28] sm:$0xf0] %v1080_v57  ;;  %1089 = vst [vmem:[#allocation3 + $0x30] sm:$0xf0] %v1081_v58  ;;  %v1056_v61 = vsel %vm2901_vm14, %v1050_v27, %v1052_v60  ;;  %v1057_v62 = vsel %vm2902_vm9, %v1052_v60, %v1054_v52  ;;  %vm2908_vm14 = vcmask 1039364   ;;  %v1246_v22 = vld [vmem:[#allocation3 + $0x18] sm:$0xff] }
 0x3c3   :  { %1064 = vst [vmem:[#allocation3 + $0x30] sm:$0xf] %v1056_v61  ;;  %1065 = vst [vmem:[#allocation3 + $0x38] sm:$0xf] %v1057_v62  ;;  %v1245_v28 = vld [vmem:[#allocation3 + $0x10] sm:$0xff]  ;;  %v1481_v57 = vld [vmem:[%s2815_s4 + $0x80] sm:$0xff] }
 0x3c4   :  { %v1079_v63 = vpop.permute.xlu0 %1078  ;;  %vm1995_vm9 = vmpackc.low %vm1230_vm2, %vm1226_vm12  ;;  %vm2915_vm12 = vcmask 916484   ;;  %vm2916_vm2 = vcmask 908288   ;;  %v1221_v58 = vld [vmem:[%s2814_s3 + $0x90] sm:$0xf]  ;;  %v1465_v60 = vld [vmem:[%s2815_s4] sm:$0xff]  ;;  %v2006_v36 = vpack.c.bf16 %v1482_v35, %v1481_v57 }
 0x3c5   :  { %v1082_v0 = vsel %vm2903_vm1, %v1077_v38, %v1079_v63  ;;  %v1112_v1 = vpop.permute.xlu1 %1111  ;;  %v1247_v9 = vld [vmem:[#allocation3 + $0x20] sm:$0xff]  ;;  %vm2909_vm1 = vcmask 916480   ;;  %v1466_v61 = vld [vmem:[%s2815_s4 + $0x8] sm:$0xff]  ;;  %v1483_v63 = vld [vmem:[%s2815_s4 + $0x90] sm:$0xff] }
 0x3c6   :  { %1090 = vst [vmem:[#allocation3 + $0x38] sm:$0xf0] %v1082_v0  ;;  %v1117_v3 = vsel %vm2904_vm6, %v1110_v39, %v1112_v1  ;;  %v1118_v4 = vsel %vm2905_vm8, %v1112_v1, %v2515_v31  ;;  %v1985_v16 = vpack.c.bf16 %v1247_v9, %v1243_v15  ;;  %vm2910_vm6 = vmmov %vm2909_vm1  ;;  %v1513_v62 = vld [vmem:[%s2815_s4 + $0x180] sm:$0xff]  ;;  %v1484_v0 = vld [vmem:[%s2815_s4 + $0x98] sm:$0xff] }
 0x3c7   :  { %1124 = vst [vmem:[#allocation3 + $0x40] sm:$0xf0] %v1117_v3  ;;  %1125 = vst [vmem:[#allocation3 + $0x48] sm:$0xf0] %v1118_v4  ;;  %v1514_v3 = vld [vmem:[%s2815_s4 + $0x188] sm:$0xff]  ;;  %v1497_v4 = vld [vmem:[%s2815_s4 + $0x100] sm:$0xff] }
 0x3c8   :  { %v1139_v8 = vpop.permute.xlu0 %1138  ;;  %vm2913_vm8 = vmmov %vm2906_vm5  ;;  %v1498_v9 = vld [vmem:[%s2815_s4 + $0x108] sm:$0xff]  ;;  %v1516_v15 = vld [vmem:[%s2815_s4 + $0x198] sm:$0xff] }
 0x3c9   :  { %v1137_v10 = vpop.permute.xlu1 %1136  ;;  %v1248_v12 = vld [vmem:[#allocation3 + $0x28] sm:$0xff]  ;;  %v1491_v35 = vld [vmem:[%s2815_s4 + $0xd0] sm:$0xff] }
 0x3ca   :  { %v1143_v13 = vsel %vm2906_vm5, %v1137_v10, %v1139_v8  ;;  %v1982_v14 = vpack.c.bf16 %v1248_v12, %v1244_v11  ;;  %v1249_v18 = vld [vmem:[#allocation3 + $0x30] sm:$0xff]  ;;  %v2010_v12 = vpack.c.bf16 %v1484_v0, %v1483_v63  ;;  %v1522_v57 = vld [vmem:[%s2815_s4 + $0x1c8] sm:$0xff] }
 0x3cb   :  { %1150 = vst [vmem:[#allocation3 + $0x68] sm:$0xf] %v1143_v13  ;;  %v1997_v29 = vpack.c.bf16 %v1249_v18, %v1245_v28  ;;  %v1468_v13 = vld [vmem:[%s2815_s4 + $0x18] sm:$0xff]  ;;  %v1485_v18 = vld [vmem:[%s2815_s4 + $0xa0] sm:$0xff]  ;;  %v1499_v28 = vld [vmem:[%s2815_s4 + $0x110] sm:$0xff] }
 0x3cc   :  { %v1116_v17 = vpop.permute.xlu0 %1115  ;;  %1984 = vmatprep.subr.msk.bf16.mxu0 %vm2248_vm13, %v1982_v14  ;;  %vm2911_vm13 = vmmov %vm2906_vm5  ;;  %v1515_v14 = vld [vmem:[%s2815_s4 + $0x190] sm:$0xff]  ;;  %v1506_v63 = vld [vmem:[%s2815_s4 + $0x148] sm:$0xff] }
 0x3cd   :  { %v1119_v20 = vsel %vm2907_vm0, %v2515_v31, %v1116_v17  ;;  %1127 = vst.msk [vmem:[#allocation3 + $0x58] sm:$0xf0] %vm2908_vm14, %v1116_v17  ;;  %1987 = vmatpush1.bf16.msk.msra.mxu0 %vm2254_vm4, %v1985_v16  ;;  %v1162_v21 = vpop.permute.xlu1 %1161  ;;  %v1250_v23 = vld [vmem:[#allocation3 + $0x38] sm:$0xff]  ;;  %vm2912_vm4 = vcmask 920576   ;;  %vm2914_vm5 = vmmov %vm2909_vm1  ;;  %vm2919_vm14 = vcmask 904192   ;;  %v2038_v17 = vpack.c.bf16 %v1514_v3, %v1513_v62  ;;  %v1505_v62 = vld [vmem:[%s2815_s4 + $0x140] sm:$0xff] }
 0x3ce   :  { %1126 = vst [vmem:[#allocation3 + $0x50] sm:$0xf0] %v1119_v20  ;;  %v1167_v24 = vsel %vm2909_vm1, %v2522_v43, %v1162_v21  ;;  %v1168_v51 = vsel %vm2910_vm6, %v1162_v21, %v2517_v32  ;;  %v1994_v26 = vpack.c.bf16 %v1250_v23, %v1246_v22  ;;  %v1252_v59 = vld [vmem:[#allocation3 + $0x48] sm:$0xff]  ;;  %v1251_v44 = vld [vmem:[#allocation3 + $0x40] sm:$0xff]  ;;  %vm2918_vm0 = vmmov %vm2916_vm2  ;;  %vm2922_vm6 = vcmask 293888  }
 0x3cf   :  { %1174 = vst [vmem:[#allocation3 + $0x60] sm:$0xf0] %v1167_v24  ;;  %1175 = vst [vmem:[#allocation3 + $0x68] sm:$0xf0] %v1168_v51  ;;  %v1486_v20 = vld [vmem:[%s2815_s4 + $0xa8] sm:$0xff]  ;;  %v2040_v23 = vpack.c.bf16 %v1498_v9, %v1497_v4  ;;  %v2056_v3 = vpack.c.bf16 %v1506_v63, %v1505_v62  ;;  %v1507_v9 = vld [vmem:[%s2815_s4 + $0x150] sm:$0xff] }
 0x3d0   :  { %v1141_v30 = vpop.permute.xlu0 %1140  ;;  %1996 = vmatprep.subr.msk.bf16.mxu1 %vm1995_vm9, %v1994_v26  ;;  %vm1241_vm9 = vcmp.ne.f32.partialorder %v1221_v58, 0.0  ;;  %v2042_v26 = vpack.c.bf16 %v1516_v15, %v1515_v14  ;;  %v1492_v58 = vld [vmem:[%s2815_s4 + $0xd8] sm:$0xff]  ;;  %v1477_v14 = vld [vmem:[%s2815_s4 + $0x60] sm:$0xff]  ;;  %v1478_v15 = vld [vmem:[%s2815_s4 + $0x68] sm:$0xff] }
 0x3d1   :  { %v1144_v54 = vsel %vm2911_vm13, %v1139_v8, %v1141_v30  ;;  %1152 = vst.msk [vmem:[#allocation3 + $0x78] sm:$0xf] %vm2912_vm4, %v1141_v30  ;;  %1999 = vmatpush1.bf16.msk.msra.mxu1 %vm2269_vm11, %v1997_v29  ;;  %v1135_v31 = vpop.permute.xlu1 %1134  ;;  %vm2917_vm11 = vmmov %vm2916_vm2  ;;  %v2008_v8 = vpack.c.bf16 %v1466_v61, %v1465_v60  ;;  %v1500_v29 = vld [vmem:[%s2815_s4 + $0x118] sm:$0xff]  ;;  %v1469_v30 = vld [vmem:[%s2815_s4 + $0x20] sm:$0xff]  ;;  %v2026_v0 = vpack.c.bf16 %v1492_v58, %v1491_v35 }
 0x3d2   :  { %1151 = vst [vmem:[#allocation3 + $0x70] sm:$0xf] %v1144_v54  ;;  %v1142_v25 = vsel %vm2913_vm8, %v1135_v31, %v1137_v10  ;;  %v1467_v10 = vld [vmem:[%s2815_s4 + $0x10] sm:$0xff]  ;;  %v2014_v54 = vpack.c.bf16 %v1486_v20, %v1485_v18  ;;  %v1470_v31 = vld [vmem:[%s2815_s4 + $0x28] sm:$0xff]  ;;  %vm2925_vm8 = vmmov %vm2922_vm6 }
 0x3d3   :  { %1149 = vst [vmem:[#allocation3 + $0x60] sm:$0xf] %v1142_v25  ;;  %v2012_v51 = vpack.c.bf16 %v1468_v13, %v1467_v10  ;;  %v1517_v25 = vld [vmem:[%s2815_s4 + $0x1a0] sm:$0xff]  ;;  %v1508_v10 = vld [vmem:[%s2815_s4 + $0x158] sm:$0xff]  ;;  %v1494_v13 = vld [vmem:[%s2815_s4 + $0xe8] sm:$0xff] }
 0x3d4   :  { %v1166_v33 = vpop.permute.xlu0 %1165  ;;  %v1254_v47 = vld [vmem:[#allocation3 + $0x58] sm:$0xff]  ;;  %v1525_v18 = vld [vmem:[%s2815_s4 + $0x1e0] sm:$0xff]  ;;  %v1526_v20 = vld [vmem:[%s2815_s4 + $0x1e8] sm:$0xff] }
 0x3d5   :  { %v1169_v37 = vsel %vm2914_vm5, %v2517_v32, %v1166_v33  ;;  %1177 = vst.msk [vmem:[#allocation3 + $0x78] sm:$0xf0] %vm2915_vm12, %v1166_v33  ;;  %v1187_v38 = vpop.permute.xlu1 %1186  ;;  %v1253_v50 = vld [vmem:[#allocation3 + $0x50] sm:$0xff]  ;;  %v1518_v33 = vld [vmem:[%s2815_s4 + $0x1a8] sm:$0xff]  ;;  %vm2122_vm5 = vmmov 0   ;;  %vm1682_vm12 = vcmask 31744  }
 0x3d6   :  { %1176 = vst [vmem:[#allocation3 + $0x70] sm:$0xf0] %v1169_v37  ;;  %v1256_v39 = vld [vmem:[#allocation3 + $0x68] sm:$0xff]  ;;  %v1487_v37 = vld [vmem:[%s2815_s4 + $0xb0] sm:$0xff] }
 0x3d7   :  { %v1988_v40 = vpack.c.bf16 %v1256_v39, %v1252_v59  ;;  %v2044_v59 = vpack.c.bf16 %v1500_v29, %v1499_v28  ;;  %v2016_v39 = vpack.c.bf16 %v1470_v31, %v1469_v30  ;;  %v1479_v28 = vld [vmem:[%s2815_s4 + $0x70] sm:$0xff]  ;;  %v1480_v29 = vld [vmem:[%s2815_s4 + $0x78] sm:$0xff] }
 0x3d8   :  { %v1189_v41 = vpop.permute.xlu0 %1188  ;;  %v1527_v31 = vld [vmem:[%s2815_s4 + $0x1f0] sm:$0xff] }
 0x3d9   :  { %v1193_v2 = vsel %vm2916_vm2, %v1187_v38, %v1189_v41  ;;  %1990 = vmatprep.subr.msk.bf16.mxu0 %vm2290_vm15, %v1988_v40  ;;  %v1185_v42 = vpop.permute.xlu1 %1184  ;;  %vm1239_vm15 = vcmp.ne.f32.partialorder %v1219_v53, 0.0  ;;  %v2046_v40 = vpack.c.bf16 %v1518_v33, %v1517_v25  ;;  %v1528_v25 = vld [vmem:[%s2815_s4 + $0x1f8] sm:$0xff] }
 0x3da   :  { %1200 = vst [vmem:[#allocation3 + $0x88] sm:$0xf] %v1193_v2  ;;  %v1192_v43 = vsel %vm2917_vm11, %v1185_v42, %v1187_v38  ;;  %v1255_v45 = vld [vmem:[#allocation3 + $0x60] sm:$0xff]  ;;  %v1488_v38 = vld [vmem:[%s2815_s4 + $0xb8] sm:$0xff]  ;;  %v1502_v2 = vld [vmem:[%s2815_s4 + $0x128] sm:$0xff]  ;;  %v2066_v33 = vpack.c.bf16 %v1528_v25, %v1527_v31  ;;  %vm1759_vm11 = vcmask 9216  }
 0x3db   :  { %1199 = vst [vmem:[#allocation3 + $0x80] sm:$0xf] %v1192_v43  ;;  %v1991_v32 = vpack.c.bf16 %v1255_v45, %v1251_v44  ;;  %v1471_v42 = vld [vmem:[%s2815_s4 + $0x30] sm:$0xff]  ;;  %v2018_v43 = vpack.c.bf16 %v1488_v38, %v1487_v37  ;;  %v1472_v44 = vld [vmem:[%s2815_s4 + $0x38] sm:$0xff] }
 0x3dc   :  { %v1191_v46 = vpop.permute.xlu0 %1190  ;;  %v1258_v27 = vld [vmem:[#allocation3 + $0x78] sm:$0xff]  ;;  %v1519_v45 = vld [vmem:[%s2815_s4 + $0x1b0] sm:$0xff] }
 0x3dd   :  { %v1194_v49 = vsel %vm2918_vm0, %v1189_v41, %v1191_v46  ;;  %1202 = vst.msk [vmem:[#allocation3 + $0x98] sm:$0xf] %vm2919_vm14, %v1191_v46  ;;  %1993 = vmatpush1.bf16.msk.msra.mxu0 %vm2322_vm7, %v1991_v32  ;;  %v2000_v19 = vpack.c.bf16 %v1258_v27, %v1254_v47  ;;  %v1257_v52 = vld [vmem:[#allocation3 + $0x70] sm:$0xff]  ;;  %vm1240_vm7 = vcmp.ne.f32.partialorder %v1220_v48, 0.0  ;;  %v1501_v41 = vld [vmem:[%s2815_s4 + $0x120] sm:$0xff]  ;;  %v1520_v32 = vld [vmem:[%s2815_s4 + $0x1b8] sm:$0xff]  ;;  %v2020_v48 = vpack.c.bf16 %v1472_v44, %v1471_v42 }
 0x3de   :  { %1201 = vst [vmem:[#allocation3 + $0x90] sm:$0xf] %v1194_v49  ;;  %v2003_v55 = vpack.c.bf16 %v1257_v52, %v1253_v50  ;;  %v1489_v46 = vld [vmem:[%s2815_s4 + $0xc0] sm:$0xff]  ;;  %v1490_v47 = vld [vmem:[%s2815_s4 + $0xc8] sm:$0xff]  ;;  %v2048_v27 = vpack.c.bf16 %v1502_v2, %v1501_v41  ;;  %v2050_v49 = vpack.c.bf16 %v1520_v32, %v1519_v45  ;;  %v1504_v50 = vld [vmem:[%s2815_s4 + $0x138] sm:$0xff] }
 0x3df   :  { %2002 = vmatprep.subr.msk.bf16.mxu1 %vm2318_vm10, %v2000_v19  ;;  %vm2920_vm10 = vcmask 1043456   ;;  %v1503_v19 = vld [vmem:[%s2815_s4 + $0x130] sm:$0xff]  ;;  %v1473_v52 = vld [vmem:[%s2815_s4 + $0x40] sm:$0xff]  ;;  %v2022_v53 = vpack.c.bf16 %v1490_v47, %v1489_v46  ;;  %v1512_v38 = vld [vmem:[%s2815_s4 + $0x178] sm:$0xff] }
 0x3e0   :  { %2005 = vmatpush1.bf16.msk.msra.mxu1 %vm2326_vm3, %v2003_v55  ;;  %vm1242_vm3 = vcmp.ne.f32.partialorder %v1222_v56, 0.0  ;;  %vm2921_vm1 = vmmov %vm2920_vm10  ;;  %v1474_v55 = vld [vmem:[%s2815_s4 + $0x48] sm:$0xff]  ;;  %v1521_v56 = vld [vmem:[%s2815_s4 + $0x1c0] sm:$0xff]  ;;  %v2052_v60 = vpack.c.bf16 %v1504_v50, %v1503_v19 }
 0x3e1   :  { %v1260_v1 = vld [vmem:[#allocation3 + $0x88] sm:$0xf]  ;;  %vm2923_vm13 = vmmov %vm2921_vm1  ;;  %v2024_v61 = vpack.c.bf16 %v1474_v55, %v1473_v52  ;;  %v1511_v37 = vld [vmem:[%s2815_s4 + $0x170] sm:$0xff] }
 0x3e2   :  { %v1280_v5 = vsel %vm1240_vm7, %v1260_v1, 0.0  ;;  %v1259_v7 = vld [vmem:[#allocation3 + $0x80] sm:$0xf]  ;;  %vm2924_vm4 = vmmov %vm2921_vm1  ;;  %v1475_v1 = vld [vmem:[%s2815_s4 + $0x50] sm:$0xff] }
 0x3e3   :  { %1831 = vmatprep.subr.msk.mxu0 %vm2920_vm10, %v1280_v5  ;;  %v1279_v11 = vsel %vm1239_vm15, %v1259_v7, 0.0  ;;  %v1523_v5 = vld [vmem:[%s2815_s4 + $0x1d0] sm:$0xff]  ;;  %v1524_v7 = vld [vmem:[%s2815_s4 + $0x1d8] sm:$0xff]  ;;  %vm2926_vm2 = vmmov %vm2921_vm1 }
 0x3e4   :  { %1832 = vmatpush1.msk.msra.mxu0 %vm2921_vm1, %v1279_v11  ;;  %v1262_v16 = vld [vmem:[#allocation3 + $0x98] sm:$0xf]  ;;  %v1493_v11 = vld [vmem:[%s2815_s4 + $0xe0] sm:$0xff] }
 0x3e5   :  { %1833 = vmatmul.mubr.msk.f32.vlgmr.msra.gmra.mrb[4].mxu0 %vm2922_vm6, %v1821_v34  ;;  %v1282_v21 = vsel %vm1242_vm3, %v1262_v16, 0.0  ;;  %v1261_v22 = vld [vmem:[#allocation3 + $0x90] sm:$0xf]  ;;  %2007 = vmatprep.subr.bf16.mxu0 %v2006_v36  ;;  %v1476_v36 = vld [vmem:[%s2815_s4 + $0x58] sm:$0xff]  ;;  %v2030_v16 = vpack.c.bf16 %v1494_v13, %v1493_v11 }
 0x3e6   :  { %1842 = vmatprep.subr.msk.mxu1 %vm2923_vm13, %v1282_v21  ;;  %v1281_v24 = vsel %vm1241_vm9, %v1261_v22, 0.0  ;;  %2009 = vmatpush3.bf16.msra.mxu0 %v2008_v8  ;;  %v2028_v4 = vpack.c.bf16 %v1476_v36, %v1475_v1  ;;  %v2058_v8 = vpack.c.bf16 %v1524_v7, %v1523_v5  ;;  %v2062_v21 = vpack.c.bf16 %v1526_v20, %v1525_v18  ;;  %v1495_v22 = vld [vmem:[%s2815_s4 + $0xf0] sm:$0xff] }
 0x3e7   :  { %1843 = vmatpush1.msk.msra.mxu1 %vm2924_vm4, %v1281_v24  ;;  %2011 = vmatprep.subr.bf16.mxu0 %v2010_v12  ;;  %v2060_v12 = vpack.c.bf16 %v1508_v10, %v1507_v9  ;;  %v1509_v24 = vld [vmem:[%s2815_s4 + $0x160] sm:$0xff] }
 0x3e8   :  { %1844 = vmatmul.mubr.msk.f32.vlgmr.msra.gmra.mrb[4].mxu1 %vm2925_vm8, %v1821_v34  ;;  %2039 = vmatprep.subr.bf16.mxu1 %v2038_v17  ;;  %v2054_v34 = vpack.c.bf16 %v1522_v57, %v1521_v56  ;;  %v2032_v17 = vpack.c.bf16 %v1478_v15, %v1477_v14 }
 0x3e9   :  { %2041 = vmatpush3.bf16.msra.mxu1 %v2040_v23  ;;  %v1496_v23 = vld [vmem:[%s2815_s4 + $0xf8] sm:$0xff] }
 0x3ea   :  { %2013 = vmatpush3.bf16.msra.mxu0 %v2012_v51  ;;  %2043 = vmatprep.subr.bf16.mxu1 %v2042_v26  ;;  %v2034_v51 = vpack.c.bf16 %v1496_v23, %v1495_v22  ;;  %v1510_v26 = vld [vmem:[%s2815_s4 + $0x168] sm:$0xff] }
 0x3eb   :  { %2015 = vmatprep.subr.bf16.mxu0 %v2014_v54  ;;  %v2064_v30 = vpack.c.bf16 %v1510_v26, %v1509_v24  ;;  %v2036_v54 = vpack.c.bf16 %v1480_v29, %v1479_v28 }
 0x3ed   :  { %2045 = vmatpush3.bf16.msra.mxu1 %v2044_v59  ;;  %v2068_v59 = vpack.c.bf16 %v1512_v38, %v1511_v37 }
 0x3ee   :  { %2017 = vmatpush3.bf16.msra.mxu0 %v2016_v39  ;;  %2047 = vmatprep.subr.bf16.mxu1 %v2046_v40  ;;  %v1290_v39 = vpop.permute.xlu1 %1289 }
 0x3ef   :  { %2019 = vmatprep.subr.bf16.mxu0 %v2018_v43 }
 0x3f1   :  { %2049 = vmatpush3.bf16.msra.mxu1 %v2048_v27 }
 0x3f2   :  { %2021 = vmatpush3.bf16.msra.mxu0 %v2020_v48  ;;  %2051 = vmatprep.subr.bf16.mxu1 %v2050_v49 }
 0x3f3   :  { %2023 = vmatprep.subr.bf16.mxu0 %v2022_v53 }
 0x3f5   :  { %2053 = vmatpush3.bf16.msra.mxu1 %v2052_v60 }
 0x3f6   :  { %2025 = vmatpush3.bf16.msra.mxu0 %v2024_v61  ;;  %2055 = vmatprep.subr.bf16.mxu1 %v2054_v34  ;;  %v1675_v61 = vld [vmem:[%s2816_s5] sm:$0x3]  ;;  %v1680_v34 = vpop.permute.xlu0 %1679 }
 0x3f7   :  { %2027 = vmatprep.subr.bf16.mxu0 %v2026_v0 }
 0x3f9   :  { %2057 = vmatpush3.bf16.msra.mxu1 %v2056_v3 }
 0x3fa   :  { %2029 = vmatpush3.bf16.msra.mxu0 %v2028_v4  ;;  %2059 = vmatprep.subr.bf16.mxu1 %v2058_v8 }
 0x3fb   :  { %2031 = vmatprep.subr.bf16.mxu0 %v2030_v16 }
 0x3fd   :  { %2061 = vmatpush3.bf16.msra.mxu1 %v2060_v12 }
 0x3fe   :  { %2033 = vmatpush3.bf16.msra.mxu0 %v2032_v17  ;;  %2063 = vmatprep.subr.bf16.mxu1 %v2062_v21 }
 0x3ff   :  { %2035 = vmatprep.subr.bf16.mxu0 %v2034_v51 }
 0x401   :  { %2065 = vmatpush3.bf16.msra.mxu1 %v2064_v30 }
 0x402   :  { %2037 = vmatpush3.bf16.msra.mxu0 %v2036_v54  ;;  %2067 = vmatprep.subr.bf16.mxu1 %v2066_v33 }
 0x403   :  { %1929 = vmatprep.subr.mxu0 %v2120_v6 }
 0x405   :  { %2069 = vmatpush3.bf16.msra.mxu1 %v2068_v59 }
 0x4b8   :  { %v1373_v40 = vpop.f32.mrb[4].mxu0 }
 0x4b9   :  { %v1374_v41 = vadd.f32 %v1373_v40, %v1290_v39  ;;  %v1375_v2 = vpop.f32.mrb[5].mxu0 }
 0x4ba   :  { %v1376_v42 = vadd.f32 %v1375_v2, %v1290_v39 }
 0x4bb   :  { %v1449_v43 = vmax.f32 %v1374_v41, 0.0  ;;  %v1444_v44 = vpop.f32.mrb[4].mxu1 }
 0x4bc   :  { %v1450_v45 = vmax.f32 %v1376_v42, 0.0  ;;  %v1445_v32 = vadd.f32 %v1444_v44, %v1290_v39  ;;  %v1446_v46 = vpop.f32.mrb[5].mxu1 }
 0x4bd   :  { %v1447_v47 = vadd.f32 %v1446_v46, %v1290_v39 }
 0x4be   :  { %v1457_v27 = vcombine.low %v1449_v43, %v1450_v45  ;;  %v1855_v48 = vcombine.low %v1450_v45, %v1450_v45  ;;  %v1451_v49 = vmax.f32 %v1445_v32, 0.0 }
 0x4bf   :  { %v1452_v19 = vmax.f32 %v1447_v47, 0.0 }
 0x4c0   :  { %1599 = vmatprep.mubr.f32.mxu0 %v1855_v48 }
 0x4c1   :  { %v1458_v50 = vcombine.low %v1451_v49, %v1452_v19  ;;  %v1856_v52 = vcombine.low %v1452_v19, %v1452_v19  ;;  %1600 = vmatmul.mubr.f32.vlgmr.msra.gmra.mrb[6].mxu0 %v1457_v27 }
 0x4c2   :  { %1931 = vmatprep.mubr.msk.f32.mxu0 %vm2122_vm5, %v2120_v6 }
 0x4c3   :  { %1669 = vmatprep.mubr.f32.mxu1 %v1856_v52 }
 0x4c4   :  { %1670 = vmatmul.mubr.f32.vlgmr.msra.gmra.mrb[6].mxu1 %v1458_v50 }
 0x594   :  { %v1889_v53 = vpop.f32.mrb[6].mxu0 }
 0x595   :  { %v1890_v55 = vpop.f32.mrb[7].mxu0 }
 0x596   :  { %v1891_v56 = vadd.f32 %v1890_v55, %v1889_v53 }
 0x597   :  { %v1924_v57 = vpop.f32.mrb[6].mxu1 }
 0x598   :  { %v1925_v35 = vpop.f32.mrb[7].mxu1 }
 0x599   :  { %v1926_v58 = vadd.f32 %v1925_v35, %v1924_v57 }
 0x59b   :  { %v1672_v60 = vadd.f32 %v1926_v58, %v1891_v56 }
 0x59d   :  { %1930 = vmatpush3.msk.msra.mxu0 %vm2926_vm2, %v1672_v60 }
 0x59e   :  { %1932 = vmatmul.mubr.msk.f32.vlgmr.msra.gmra.mrb[8].mxu0 %vm1682_vm12, %v1675_v61 }
 0x671   :  { %v1755_v62 = vpop.f32.mrb[8].mxu0 }
 0x672   :  { %v1756_v6 = vadd.f32 %v1755_v62, %v1680_v34  ;;  %v1933_v63 = vpop.f32.mrb[9].mxu0 }
 0x674   :  { %1760 = vst.msk [vmem:[#allocation4] sm:$0x3] %vm1759_vm11, %v1756_v6 }
 0x675   :  { %2099 = shalt.err (!%p2096_p4)
}
 0x676   :  { %s2100_s21 = scalar_lea.hbm %s2818_s7, 32 }
 0x677   :  { %p2101_p5 = scmp.ne.s32.totalorder %s2818_s7, %s2100_s21  ;;  %p2104_p6 = scmp.lt.u32.totalorder %s2100_s21, %s2818_s7 }
 0x679   :  { %p2106_p7 = pnand %p2104_p6, %p2101_p5 }
 0x67b   :  { %2109 = shalt.err (!%p2106_p7)
}
 0x67c   :  { %1770 = dma.vmem_to_hbm [thread:$0]  %s1768_s10, 32, %s2818_s7, [#allocation5]  }
 0x67d   :  { %2110 = dma.done.wait [#allocation5], 32  }
 0x67e   :  { %2111 = vsyncadd [#allocation5], 4294967264 }
 0x67f   :  { %1774 = vsyncpa [#allocation5], 1 }

</bundles_post_ra>
